<compile_context>
chip_gen: v5e
topology: v5e:2x2
jax: 0.10.0
libtpu: 0.0.40
codegen_flags: <defaults>
</compile_context>

<pallas_src>
import math
import functools

import jax
import jax.numpy as jnp
from jax.experimental import pallas as pl
from jax.experimental.pallas import tpu as pltpu


# --------------------------------------------------------------------------
# Fused kernel: grid = (batch_block, layer). One pallas_call = whole stack.
# --------------------------------------------------------------------------
def _make_encoder_kernel(num_heads, with_attn):
    H = num_heads

    def kernel(x_ref, wqkv_ref, wo_ref, w1_ref, w2_ref, vecs_ref, b1_ref,
               *out_refs):
        if with_attn:
            y_ref, attw_ref = out_refs
        else:
            (y_ref,) = out_refs

        layer = pl.program_id(1)

        # First layer of this batch block: load activations into the resident
        # output block (y_ref is the running activation state across layers).
        @pl.when(layer == 0)
        def _():
            y_ref[...] = x_ref[...]

        Bb, L, D = y_ref.shape
        hd = D // H
        N = Bb * H
        eps = 1e-5
        inv_sqrt2 = 1.0 / math.sqrt(2.0)

        x2 = y_ref[...].reshape(Bb * L, D)                 # (Bb*L, D) f32, resident

        vecs = vecs_ref[0]                                 # (9, D) f32
        ln1_w, ln1_b = vecs[0:1], vecs[1:2]
        bq, bk, bv = vecs[2:3], vecs[3:4], vecs[4:5]       # bq pre-scaled by 1/sqrt(hd)
        bo = vecs[5:6]
        ln2_w, ln2_b = vecs[6:7], vecs[7:8]
        b2 = vecs[8:9]
        b1 = b1_ref[0]                                     # (1, mlp) f32

        def layernorm(v, w, b):
            mu = jnp.mean(v, axis=-1, keepdims=True)
            c = v - mu
            var = jnp.mean(c * c, axis=-1, keepdims=True)
            return c * jax.lax.rsqrt(var + eps) * w + b

        # ---------------- PreNorm + MultiheadAttention ----------------
        xn = layernorm(x2, ln1_w, ln1_b)                   # (Bb*L, D) f32

        # Fused, lane-dense QKV projection (bf16 operands, f32 accumulation).
        qkv = jnp.dot(xn.astype(jnp.bfloat16), wqkv_ref[0],
                      preferred_element_type=jnp.float32)  # (Bb*L, 3D) f32

        def heads(z):                                      # (Bb*L, D) -> (Bb*H, L, hd)
            return (z.reshape(Bb, L, H, hd)
                     .transpose(0, 2, 1, 3)
                     .reshape(N, L, hd))

        q = heads(qkv[:, 0:D] + bq)                        # already scaled by 1/sqrt(hd)
        k = heads(qkv[:, D:2 * D] + bk)
        v = heads(qkv[:, 2 * D:3 * D] + bv)

        s = jnp.einsum('nqd,nkd->nqk',
                       q.astype(jnp.bfloat16), k.astype(jnp.bfloat16),
                       preferred_element_type=jnp.float32)  # (N, L, L)
        s = s - jnp.max(s, axis=-1, keepdims=True)
        p = jnp.exp(s)
        # Exact softmax (torch parity); the divide is only on the (N, L, 1) denom.
        p = p * (1.0 / jnp.sum(p, axis=-1, keepdims=True))

        if with_attn:
            # Head-averaged attention map (PyTorch average_attn_weights=True).
            attw_ref[0] = jnp.mean(p.reshape(Bb, H, L, L),
                                   axis=1).astype(attw_ref.dtype)

        ctx = jnp.einsum('nqk,nkd->nqd',
                         p.astype(jnp.bfloat16), v.astype(jnp.bfloat16),
                         preferred_element_type=jnp.float32)  # (N, L, hd)
        ctx2 = (ctx.reshape(Bb, H, L, hd)
                   .transpose(0, 2, 1, 3)
                   .reshape(Bb * L, D))                       # lane-dense (Bb*L, D)

        attn = jnp.dot(ctx2.astype(jnp.bfloat16), wo_ref[0],
                       preferred_element_type=jnp.float32) + bo
        x2 = x2 + attn                                        # residual 1

        # ---------------- PreNorm + FeedForward ----------------
        xn2 = layernorm(x2, ln2_w, ln2_b)
        h1 = jnp.dot(xn2.astype(jnp.bfloat16), w1_ref[0],
                     preferred_element_type=jnp.float32) + b1
        h1 = 0.5 * h1 * (1.0 + jax.lax.erf(h1 * inv_sqrt2))   # exact GELU
        h2 = jnp.dot(h1.astype(jnp.bfloat16), w2_ref[0],
                     preferred_element_type=jnp.float32) + b2
        x2 = x2 + h2                                          # residual 2

        y_ref[...] = x2.reshape(Bb, L, D)

    return kernel


# --------------------------------------------------------------------------
# Wrapper: single pallas_call over (batch_blocks, depth)
# --------------------------------------------------------------------------
def transformer_encoder_forward(x, packed, num_heads, *, batch_block=None,
                                return_attention=True,
                                attn_dtype=jnp.float32,
                                vmem_limit_bytes=None):
    B, L, D = x.shape
    depth = packed["wqkv"].shape[0]
    mlp = packed["w1"].shape[-1]
    assert D % num_heads == 0

    if batch_block is None:
        # nb >= 2 so the "parallel" batch axis can use both v7x TensorCores.
        Bb = B // 2 if (B >= 2 and B % 2 == 0) else B
    else:
        Bb = batch_block
    assert B % Bb == 0, "batch must be divisible by batch_block"
    nb = B // Bb

    if vmem_limit_bytes is None:
        w_item = jnp.dtype(packed["wqkv"].dtype).itemsize
        per_layer_w = w_item * (3 * D * D + D * D + 2 * D * mlp) + 4 * (9 * D + mlp)
        acts = 4 * Bb * L * (2 * D + 3 * D + mlp)          # x/y blocks, qkv, FFN interm.
        attn_tmp = 4 * Bb * num_heads * L * L * 2          # scores + probs
        budget = 2 * per_layer_w + acts + attn_tmp + (4 << 20)
        vmem_limit_bytes = int(min(max(budget, 32 << 20), 56 << 20))  # v7x-safe cap

    kernel = _make_encoder_kernel(num_heads, return_attention)

    in_specs = [
        pl.BlockSpec((Bb, L, D), lambda b, l: (b, 0, 0)),          # x (read at layer 0)
        pl.BlockSpec((1, D, 3 * D), lambda b, l: (l, 0, 0)),       # wqkv (bf16, streamed)
        pl.BlockSpec((1, D, D), lambda b, l: (l, 0, 0)),           # wo
        pl.BlockSpec((1, D, mlp), lambda b, l: (l, 0, 0)),         # w1
        pl.BlockSpec((1, mlp, D), lambda b, l: (l, 0, 0)),         # w2
        pl.BlockSpec((1, 9, D), lambda b, l: (l, 0, 0)),           # packed small vectors
        pl.BlockSpec((1, 1, mlp), lambda b, l: (l, 0, 0)),         # b1
    ]
    out_specs = [pl.BlockSpec((Bb, L, D), lambda b, l: (b, 0, 0))]  # y (resident state)
    out_shape = [jax.ShapeDtypeStruct((B, L, D), jnp.float32)]
    if return_attention:
        out_specs.append(pl.BlockSpec((1, Bb, L, L), lambda b, l: (l, b, 0, 0)))
        out_shape.append(jax.ShapeDtypeStruct((depth, B, L, L), attn_dtype))

    outs = pl.pallas_call(
        kernel,
        grid=(nb, depth),
        in_specs=in_specs,
        out_specs=out_specs,
        out_shape=out_shape,
        compiler_params=pltpu.CompilerParams(
            dimension_semantics=("parallel", "arbitrary"),
            vmem_limit_bytes=vmem_limit_bytes),
    )(x, packed["wqkv"], packed["wo"], packed["w1"], packed["w2"],
      packed["vecs"], packed["b1"])

    if return_attention:
        y, attw = outs
        return y, [attw[i] for i in range(depth)]
    y = outs[0] if isinstance(outs, (list, tuple)) else outs
    return y, []


# --------------------------------------------------------------------------
# Parameters: PyTorch-layout init + conversion to the kernel layout
# --------------------------------------------------------------------------
def init_layer_params_torch(key, dim, mlp_dim):
    ks = jax.random.split(key, 8)
    s = 0.05
    return {
        "ln1_w": jnp.ones((dim,), jnp.float32),
        "ln1_b": jnp.zeros((dim,), jnp.float32),
        "in_proj_weight": s * jax.random.normal(ks[0], (3 * dim, dim), jnp.float32),
        "in_proj_bias":   s * jax.random.normal(ks[1], (3 * dim,), jnp.float32),
        "out_proj_weight": s * jax.random.normal(ks[2], (dim, dim), jnp.float32),
        "out_proj_bias":   s * jax.random.normal(ks[3], (dim,), jnp.float32),
        "ln2_w": jnp.ones((dim,), jnp.float32),
        "ln2_b": jnp.zeros((dim,), jnp.float32),
        "lin1_weight": s * jax.random.normal(ks[4], (mlp_dim, dim), jnp.float32),
        "lin1_bias":   s * jax.random.normal(ks[5], (mlp_dim,), jnp.float32),
        "lin2_weight": s * jax.random.normal(ks[6], (dim, mlp_dim), jnp.float32),
        "lin2_bias":   s * jax.random.normal(ks[7], (dim,), jnp.float32),
    }


def pack_params(layer_params, num_heads, *, matmul_dtype=jnp.bfloat16):
    """Stack per-layer PyTorch-layout params into depth-stacked, lane-dense arrays.

    Big matmul weights are emitted in bf16 (f32 accumulation in the kernel);
    1/sqrt(head_dim) is folded into wqkv's q columns and into bq.  The small
    per-layer vectors are packed into a single (depth, 9, D) f32 array:
    rows = [ln1_w, ln1_b, bq, bk, bv, bo, ln2_w, ln2_b, b2].
    """
    D = layer_params[0]["out_proj_weight"].shape[0]
    H = num_heads
    hd = D // H
    scale = 1.0 / math.sqrt(hd)

    def per_layer(p):
        wqkv = p["in_proj_weight"].T                      # (D, 3D), columns [q | k | v]
        wqkv = wqkv.at[:, :D].multiply(scale)             # fold attention scale into q
        b = p["in_proj_bias"]
        bq = b[:D] * scale
        bk = b[D:2 * D]
        bv = b[2 * D:]
        vecs = jnp.stack(
            [p["ln1_w"], p["ln1_b"], bq, bk, bv,
             p["out_proj_bias"], p["ln2_w"], p["ln2_b"], p["lin2_bias"]],
            axis=0).astype(jnp.float32)                   # (9, D)
        return {
            "wqkv": wqkv.astype(matmul_dtype),            # (D, 3D)
            "wo": p["out_proj_weight"].T.astype(matmul_dtype),   # (D, D)
            "w1": p["lin1_weight"].T.astype(matmul_dtype),       # (D, mlp)
            "w2": p["lin2_weight"].T.astype(matmul_dtype),       # (mlp, D)
            "vecs": vecs,                                        # (9, D)
            "b1": p["lin1_bias"][None, :].astype(jnp.float32),   # (1, mlp)
        }

    per = [per_layer(p) for p in layer_params]
    return {k: jnp.stack([pl_[k] for pl_ in per], axis=0) for k in per[0]}


if __name__ == "__main__":
    # Small shapes consistent with the module: x is (B, L, dim), batch_first.
    B, L = 2, 8
    dim, depth, heads, mlp_dim = 32, 2, 4, 64

    key = jax.random.PRNGKey(0)
    kx, *kls = jax.random.split(key, depth + 1)
    x = jax.random.normal(kx, (B, L, dim), jnp.float32)
    torch_layers = [init_layer_params_torch(k, dim, mlp_dim) for k in kls]
    packed = pack_params(torch_layers, heads)

    # Full forward (matches the module: returns (x, list of attention maps)).
    y, l_attn = transformer_encoder_forward(x, packed, heads)
    y = jax.block_until_ready(y)
    l_attn = [jax.block_until_ready(a) for a in l_attn]
    assert y.shape == (B, L, dim)
    assert len(l_attn) == depth and l_attn[0].shape == (B, L, L)

    # Optional fast path: skip the attention-weights HBM write entirely.
    y2, _ = transformer_encoder_forward(x, packed, heads, return_attention=False)
    y2 = jax.block_until_ready(y2)
    assert y2.shape == (B, L, dim)

    print("KERNEL_OK")
</pallas_src>

<mosaic_0001>
module attributes {stable_mosaic.version = 11 : i64} {
  func.func @kernel(%arg0: i32, %arg1: i32, %arg2: memref<1x8x32xf32, #tpu.memory_space<vmem>>, %arg3: memref<1x32x96xbf16, #tpu.memory_space<vmem>>, %arg4: memref<1x32x32xbf16, #tpu.memory_space<vmem>>, %arg5: memref<1x32x64xbf16, #tpu.memory_space<vmem>>, %arg6: memref<1x64x32xbf16, #tpu.memory_space<vmem>>, %arg7: memref<1x9x32xf32, #tpu.memory_space<vmem>>, %arg8: memref<1x1x64xf32, #tpu.memory_space<vmem>>, %arg9: memref<1x8x32xf32, #tpu.memory_space<vmem>>, %arg10: memref<1x1x8x8xf32, #tpu.memory_space<vmem>>) attributes {dimension_semantics = [#tpu.dimension_semantics<parallel>, #tpu.dimension_semantics<arbitrary>], iteration_bounds = array<i64: 2, 2>, scalar_prefetch = 0 : i64, scratch_operands = 0 : i64, tpu.core_type = #tpu.core_type<tc>, window_params = [{transform_indices = @transform_0, window_bounds = array<i64: 1, 8, 32>}, {transform_indices = @transform_1, window_bounds = array<i64: 1, 32, 96>}, {transform_indices = @transform_2, window_bounds = array<i64: 1, 32, 32>}, {transform_indices = @transform_3, window_bounds = array<i64: 1, 32, 64>}, {transform_indices = @transform_4, window_bounds = array<i64: 1, 64, 32>}, {transform_indices = @transform_5, window_bounds = array<i64: 1, 9, 32>}, {transform_indices = @transform_6, window_bounds = array<i64: 1, 1, 64>}, {transform_indices = @transform_7, window_bounds = array<i64: 1, 8, 32>}, {transform_indices = @transform_8, window_bounds = array<i64: 1, 1, 8, 8>}]} {
    %c0_i32 = arith.constant 0 : i32
    %0 = arith.cmpi eq, %arg1, %c0_i32 : i32
    %1 = arith.extui %0 : i1 to i32
    %c0_i32_0 = arith.constant 0 : i32
    %2 = arith.cmpi ne, %1, %c0_i32_0 : i32
    scf.if %2 {
      %c0_51 = arith.constant 0 : index
      %c0_52 = arith.constant 0 : index
      %c0_53 = arith.constant 0 : index
      %137 = vector.load %arg2[%c0_51, %c0_52, %c0_53] : memref<1x8x32xf32, #tpu.memory_space<vmem>>, vector<1x8x32xf32>
      %c0_54 = arith.constant 0 : index
      %c0_55 = arith.constant 0 : index
      %c0_56 = arith.constant 0 : index
      %138 = vector.load %arg9[%c0_54, %c0_55, %c0_56] : memref<1x8x32xf32, #tpu.memory_space<vmem>>, vector<1x8x32xf32>
      tpu.vector_store %arg9[%c0_54, %c0_55, %c0_56], %137 {strides = array<i32>} : memref<1x8x32xf32, #tpu.memory_space<vmem>>, vector<1x8x32xf32>,
    } else {
    }
    %c0 = arith.constant 0 : index
    %c0_1 = arith.constant 0 : index
    %c0_2 = arith.constant 0 : index
    %3 = vector.load %arg9[%c0, %c0_1, %c0_2] : memref<1x8x32xf32, #tpu.memory_space<vmem>>, vector<1x8x32xf32>
    %4 = vector.shape_cast %3 : vector<1x8x32xf32> to vector<8x32xf32>
    %c0_3 = arith.constant 0 : index
    %c0_4 = arith.constant 0 : index
    %c0_5 = arith.constant 0 : index
    %5 = vector.load %arg7[%c0_3, %c0_4, %c0_5] : memref<1x9x32xf32, #tpu.memory_space<vmem>>, vector<1x9x32xf32>
    %6 = vector.shape_cast %5 : vector<1x9x32xf32> to vector<9x32xf32>
    %7 = vector.extract_strided_slice %6 {offsets = [0, 0], sizes = [1, 32], strides = [1, 1]} : vector<9x32xf32> to vector<1x32xf32>
    %8 = vector.extract_strided_slice %6 {offsets = [1, 0], sizes = [1, 32], strides = [1, 1]} : vector<9x32xf32> to vector<1x32xf32>
    %9 = vector.extract_strided_slice %6 {offsets = [2, 0], sizes = [1, 32], strides = [1, 1]} : vector<9x32xf32> to vector<1x32xf32>
    %10 = vector.extract_strided_slice %6 {offsets = [3, 0], sizes = [1, 32], strides = [1, 1]} : vector<9x32xf32> to vector<1x32xf32>
    %11 = vector.extract_strided_slice %6 {offsets = [4, 0], sizes = [1, 32], strides = [1, 1]} : vector<9x32xf32> to vector<1x32xf32>
    %12 = vector.extract_strided_slice %6 {offsets = [5, 0], sizes = [1, 32], strides = [1, 1]} : vector<9x32xf32> to vector<1x32xf32>
    %13 = vector.extract_strided_slice %6 {offsets = [6, 0], sizes = [1, 32], strides = [1, 1]} : vector<9x32xf32> to vector<1x32xf32>
    %14 = vector.extract_strided_slice %6 {offsets = [7, 0], sizes = [1, 32], strides = [1, 1]} : vector<9x32xf32> to vector<1x32xf32>
    %15 = vector.extract_strided_slice %6 {offsets = [8, 0], sizes = [1, 32], strides = [1, 1]} : vector<9x32xf32> to vector<1x32xf32>
    %c0_6 = arith.constant 0 : index
    %c0_7 = arith.constant 0 : index
    %c0_8 = arith.constant 0 : index
    %16 = vector.load %arg8[%c0_6, %c0_7, %c0_8] : memref<1x1x64xf32, #tpu.memory_space<vmem>>, vector<1x1x64xf32>
    %17 = vector.shape_cast %16 : vector<1x1x64xf32> to vector<1x64xf32>
    %cst = arith.constant dense<0.000000e+00> : vector<8xf32>
    %18 = vector.multi_reduction <add>, %4, %cst [1] : vector<8x32xf32> to vector<8xf32>
    %19 = vector.shape_cast %18 : vector<8xf32> to vector<8x1xf32>
    %cst_9 = arith.constant 3.200000e+01 : f32
    %20 = vector.broadcast %cst_9 : f32 to vector<8x1xf32>
    %21 = arith.divf %19, %20 : vector<8x1xf32>
    %22 = vector.broadcast %21 : vector<8x1xf32> to vector<8x32xf32>
    %23 = arith.subf %4, %22 : vector<8x32xf32>
    %24 = arith.mulf %23, %23 : vector<8x32xf32>
    %cst_10 = arith.constant dense<0.000000e+00> : vector<8xf32>
    %25 = vector.multi_reduction <add>, %24, %cst_10 [1] : vector<8x32xf32> to vector<8xf32>
    %26 = vector.shape_cast %25 : vector<8xf32> to vector<8x1xf32>
    %cst_11 = arith.constant 3.200000e+01 : f32
    %27 = vector.broadcast %cst_11 : f32 to vector<8x1xf32>
    %28 = arith.divf %26, %27 : vector<8x1xf32>
    %cst_12 = arith.constant 9.99999974E-6 : f32
    %29 = vector.broadcast %cst_12 : f32 to vector<8x1xf32>
    %30 = arith.addf %28, %29 : vector<8x1xf32>
    %31 = math.rsqrt %30 : vector<8x1xf32>
    %32 = vector.broadcast %31 : vector<8x1xf32> to vector<8x32xf32>
    %33 = arith.mulf %23, %32 : vector<8x32xf32>
    %34 = vector.broadcast %7 : vector<1x32xf32> to vector<8x32xf32>
    %35 = arith.mulf %33, %34 : vector<8x32xf32>
    %36 = vector.broadcast %8 : vector<1x32xf32> to vector<8x32xf32>
    %37 = arith.addf %35, %36 : vector<8x32xf32>
    %38 = arith.truncf %37 : vector<8x32xf32> to vector<8x32xbf16>
    %c0_13 = arith.constant 0 : index
    %c0_14 = arith.constant 0 : index
    %c0_15 = arith.constant 0 : index
    %39 = vector.load %arg3[%c0_13, %c0_14, %c0_15] : memref<1x32x96xbf16, #tpu.memory_space<vmem>>, vector<1x32x96xbf16>
    %40 = vector.shape_cast %39 : vector<1x32x96xbf16> to vector<32x96xbf16>
    %cst_16 = arith.constant dense<0.000000e+00> : vector<8x96xf32>
    %41 = tpu.matmul %38, %40, %cst_16 {dimension_numbers = #tpu.dot_dimension_numbers<[1], [0], [0], [1], [0, 0, 1, 1], [], []>} : vector<8x32xbf16>, vector<32x96xbf16>, vector<8x96xf32> -> vector<8x96xf32>
    %42 = vector.extract_strided_slice %41 {offsets = [0, 0], sizes = [8, 32], strides = [1, 1]} : vector<8x96xf32> to vector<8x32xf32>
    %43 = vector.broadcast %9 : vector<1x32xf32> to vector<8x32xf32>
    %44 = arith.addf %42, %43 : vector<8x32xf32>
    %45 = vector.shape_cast %44 : vector<8x32xf32> to vector<1x8x4x8xf32>
    %46 = tpu.transpose %45, [0, 2, 1, 3] : vector<1x8x4x8xf32> -> vector<1x4x8x8xf32>
    %47 = vector.shape_cast %46 : vector<1x4x8x8xf32> to vector<4x8x8xf32>
    %48 = vector.extract_strided_slice %41 {offsets = [0, 32], sizes = [8, 32], strides = [1, 1]} : vector<8x96xf32> to vector<8x32xf32>
    %49 = vector.broadcast %10 : vector<1x32xf32> to vector<8x32xf32>
    %50 = arith.addf %48, %49 : vector<8x32xf32>
    %51 = vector.shape_cast %50 : vector<8x32xf32> to vector<1x8x4x8xf32>
    %52 = tpu.transpose %51, [0, 2, 1, 3] : vector<1x8x4x8xf32> -> vector<1x4x8x8xf32>
    %53 = vector.shape_cast %52 : vector<1x4x8x8xf32> to vector<4x8x8xf32>
    %54 = vector.extract_strided_slice %41 {offsets = [0, 64], sizes = [8, 32], strides = [1, 1]} : vector<8x96xf32> to vector<8x32xf32>
    %55 = vector.broadcast %11 : vector<1x32xf32> to vector<8x32xf32>
    %56 = arith.addf %54, %55 : vector<8x32xf32>
    %57 = vector.shape_cast %56 : vector<8x32xf32> to vector<1x8x4x8xf32>
    %58 = tpu.transpose %57, [0, 2, 1, 3] : vector<1x8x4x8xf32> -> vector<1x4x8x8xf32>
    %59 = vector.shape_cast %58 : vector<1x4x8x8xf32> to vector<4x8x8xf32>
    %60 = arith.truncf %47 : vector<4x8x8xf32> to vector<4x8x8xbf16>
    %61 = arith.truncf %53 : vector<4x8x8xf32> to vector<4x8x8xbf16>
    "tpu.trace_start"() <{level = 10 : i32, message = "nqd,nkd->nqk"}> : () -> ()
    %cst_17 = arith.constant dense<0.000000e+00> : vector<4x8x8xf32>
    %62 = tpu.matmul %60, %61, %cst_17 {dimension_numbers = #tpu.dot_dimension_numbers<[2], [2], [1], [1], [0, 0, 0, 1, 1, 1], [0], [0]>} : vector<4x8x8xbf16>, vector<4x8x8xbf16>, vector<4x8x8xf32> -> vector<4x8x8xf32>
    "tpu.trace_stop"() : () -> ()
    %cst_18 = arith.constant dense<0xFF800000> : vector<4x8xf32>
    %63 = vector.multi_reduction <maximumf>, %62, %cst_18 [2] : vector<4x8x8xf32> to vector<4x8xf32>
    %64 = vector.shape_cast %63 : vector<4x8xf32> to vector<4x8x1xf32>
    %65 = vector.broadcast %64 : vector<4x8x1xf32> to vector<4x8x8xf32>
    %66 = arith.subf %62, %65 : vector<4x8x8xf32>
    %67 = math.exp %66 : vector<4x8x8xf32>
    %cst_19 = arith.constant dense<0.000000e+00> : vector<4x8xf32>
    %68 = vector.multi_reduction <add>, %67, %cst_19 [2] : vector<4x8x8xf32> to vector<4x8xf32>
    %69 = vector.shape_cast %68 : vector<4x8xf32> to vector<4x8x1xf32>
    %cst_20 = arith.constant 1.000000e+00 : f32
    %70 = vector.broadcast %cst_20 : f32 to vector<4x8x1xf32>
    %71 = arith.divf %70, %69 : vector<4x8x1xf32>
    %72 = vector.broadcast %71 : vector<4x8x1xf32> to vector<4x8x8xf32>
    %73 = arith.mulf %67, %72 : vector<4x8x8xf32>
    %74 = vector.shape_cast %73 : vector<4x8x8xf32> to vector<1x4x8x8xf32>
    %cst_21 = arith.constant dense<0.000000e+00> : vector<1x8x8xf32>
    %75 = vector.multi_reduction <add>, %74, %cst_21 [1] : vector<1x4x8x8xf32> to vector<1x8x8xf32>
    %cst_22 = arith.constant 4.000000e+00 : f32
    %76 = vector.broadcast %cst_22 : f32 to vector<1x8x8xf32>
    %77 = arith.divf %75, %76 : vector<1x8x8xf32>
    %c0_23 = arith.constant 0 : index
    %c0_24 = arith.constant 0 : index
    %c0_25 = arith.constant 0 : index
    %c0_26 = arith.constant 0 : index
    %78 = vector.load %arg10[%c0_23, %c0_24, %c0_25, %c0_26] : memref<1x1x8x8xf32, #tpu.memory_space<vmem>>, vector<1x1x8x8xf32>
    %79 = vector.shape_cast %78 : vector<1x1x8x8xf32> to vector<1x8x8xf32>
    %80 = vector.shape_cast %77 : vector<1x8x8xf32> to vector<1x1x8x8xf32>
    tpu.vector_store %arg10[%c0_23, %c0_24, %c0_25, %c0_26], %80 {strides = array<i32>} : memref<1x1x8x8xf32, #tpu.memory_space<vmem>>, vector<1x1x8x8xf32>,
    %81 = arith.truncf %73 : vector<4x8x8xf32> to vector<4x8x8xbf16>
    %82 = arith.truncf %59 : vector<4x8x8xf32> to vector<4x8x8xbf16>
    "tpu.trace_start"() <{level = 10 : i32, message = "nqk,nkd->nqd"}> : () -> ()
    %cst_27 = arith.constant dense<0.000000e+00> : vector<4x8x8xf32>
    %83 = tpu.matmul %81, %82, %cst_27 {dimension_numbers = #tpu.dot_dimension_numbers<[2], [1], [1], [2], [0, 0, 0, 1, 1, 2], [0], [0]>} : vector<4x8x8xbf16>, vector<4x8x8xbf16>, vector<4x8x8xf32> -> vector<4x8x8xf32>
    "tpu.trace_stop"() : () -> ()
    %84 = vector.shape_cast %83 : vector<4x8x8xf32> to vector<1x4x8x8xf32>
    %85 = tpu.transpose %84, [0, 2, 1, 3] : vector<1x4x8x8xf32> -> vector<1x8x4x8xf32>
    %86 = vector.shape_cast %85 : vector<1x8x4x8xf32> to vector<8x32xf32>
    %87 = arith.truncf %86 : vector<8x32xf32> to vector<8x32xbf16>
    %c0_28 = arith.constant 0 : index
    %c0_29 = arith.constant 0 : index
    %c0_30 = arith.constant 0 : index
    %88 = vector.load %arg4[%c0_28, %c0_29, %c0_30] : memref<1x32x32xbf16, #tpu.memory_space<vmem>>, vector<1x32x32xbf16>
    %89 = vector.shape_cast %88 : vector<1x32x32xbf16> to vector<32x32xbf16>
    %cst_31 = arith.constant dense<0.000000e+00> : vector<8x32xf32>
    %90 = tpu.matmul %87, %89, %cst_31 {dimension_numbers = #tpu.dot_dimension_numbers<[1], [0], [0], [1], [0, 0, 1, 1], [], []>} : vector<8x32xbf16>, vector<32x32xbf16>, vector<8x32xf32> -> vector<8x32xf32>
    %91 = vector.broadcast %12 : vector<1x32xf32> to vector<8x32xf32>
    %92 = arith.addf %90, %91 : vector<8x32xf32>
    %93 = arith.addf %4, %92 : vector<8x32xf32>
    %cst_32 = arith.constant dense<0.000000e+00> : vector<8xf32>
    %94 = vector.multi_reduction <add>, %93, %cst_32 [1] : vector<8x32xf32> to vector<8xf32>
    %95 = vector.shape_cast %94 : vector<8xf32> to vector<8x1xf32>
    %cst_33 = arith.constant 3.200000e+01 : f32
    %96 = vector.broadcast %cst_33 : f32 to vector<8x1xf32>
    %97 = arith.divf %95, %96 : vector<8x1xf32>
    %98 = vector.broadcast %97 : vector<8x1xf32> to vector<8x32xf32>
    %99 = arith.subf %93, %98 : vector<8x32xf32>
    %100 = arith.mulf %99, %99 : vector<8x32xf32>
    %cst_34 = arith.constant dense<0.000000e+00> : vector<8xf32>
    %101 = vector.multi_reduction <add>, %100, %cst_34 [1] : vector<8x32xf32> to vector<8xf32>
    %102 = vector.shape_cast %101 : vector<8xf32> to vector<8x1xf32>
    %cst_35 = arith.constant 3.200000e+01 : f32
    %103 = vector.broadcast %cst_35 : f32 to vector<8x1xf32>
    %104 = arith.divf %102, %103 : vector<8x1xf32>
    %cst_36 = arith.constant 9.99999974E-6 : f32
    %105 = vector.broadcast %cst_36 : f32 to vector<8x1xf32>
    %106 = arith.addf %104, %105 : vector<8x1xf32>
    %107 = math.rsqrt %106 : vector<8x1xf32>
    %108 = vector.broadcast %107 : vector<8x1xf32> to vector<8x32xf32>
    %109 = arith.mulf %99, %108 : vector<8x32xf32>
    %110 = vector.broadcast %13 : vector<1x32xf32> to vector<8x32xf32>
    %111 = arith.mulf %109, %110 : vector<8x32xf32>
    %112 = vector.broadcast %14 : vector<1x32xf32> to vector<8x32xf32>
    %113 = arith.addf %111, %112 : vector<8x32xf32>
    %114 = arith.truncf %113 : vector<8x32xf32> to vector<8x32xbf16>
    %c0_37 = arith.constant 0 : index
    %c0_38 = arith.constant 0 : index
    %c0_39 = arith.constant 0 : index
    %115 = vector.load %arg5[%c0_37, %c0_38, %c0_39] : memref<1x32x64xbf16, #tpu.memory_space<vmem>>, vector<1x32x64xbf16>
    %116 = vector.shape_cast %115 : vector<1x32x64xbf16> to vector<32x64xbf16>
    %cst_40 = arith.constant dense<0.000000e+00> : vector<8x64xf32>
    %117 = tpu.matmul %114, %116, %cst_40 {dimension_numbers = #tpu.dot_dimension_numbers<[1], [0], [0], [1], [0, 0, 1, 1], [], []>} : vector<8x32xbf16>, vector<32x64xbf16>, vector<8x64xf32> -> vector<8x64xf32>
    %118 = vector.broadcast %17 : vector<1x64xf32> to vector<8x64xf32>
    %119 = arith.addf %117, %118 : vector<8x64xf32>
    %cst_41 = arith.constant 5.000000e-01 : f32
    %120 = vector.broadcast %cst_41 : f32 to vector<8x64xf32>
    %121 = arith.mulf %120, %119 : vector<8x64xf32>
    %cst_42 = arith.constant 0.707106769 : f32
    %122 = vector.broadcast %cst_42 : f32 to vector<8x64xf32>
    %123 = arith.mulf %119, %122 : vector<8x64xf32>
    %124 = math.erf %123 : vector<8x64xf32>
    %cst_43 = arith.constant 1.000000e+00 : f32
    %125 = vector.broadcast %cst_43 : f32 to vector<8x64xf32>
    %126 = arith.addf %125, %124 : vector<8x64xf32>
    %127 = arith.mulf %121, %126 : vector<8x64xf32>
    %128 = arith.truncf %127 : vector<8x64xf32> to vector<8x64xbf16>
    %c0_44 = arith.constant 0 : index
    %c0_45 = arith.constant 0 : index
    %c0_46 = arith.constant 0 : index
    %129 = vector.load %arg6[%c0_44, %c0_45, %c0_46] : memref<1x64x32xbf16, #tpu.memory_space<vmem>>, vector<1x64x32xbf16>
    %130 = vector.shape_cast %129 : vector<1x64x32xbf16> to vector<64x32xbf16>
    %cst_47 = arith.constant dense<0.000000e+00> : vector<8x32xf32>
    %131 = tpu.matmul %128, %130, %cst_47 {dimension_numbers = #tpu.dot_dimension_numbers<[1], [0], [0], [1], [0, 0, 1, 1], [], []>} : vector<8x64xbf16>, vector<64x32xbf16>, vector<8x32xf32> -> vector<8x32xf32>
    %132 = vector.broadcast %15 : vector<1x32xf32> to vector<8x32xf32>
    %133 = arith.addf %131, %132 : vector<8x32xf32>
    %134 = arith.addf %93, %133 : vector<8x32xf32>
    %135 = vector.shape_cast %134 : vector<8x32xf32> to vector<1x8x32xf32>
    %c0_48 = arith.constant 0 : index
    %c0_49 = arith.constant 0 : index
    %c0_50 = arith.constant 0 : index
    %136 = vector.load %arg9[%c0_48, %c0_49, %c0_50] : memref<1x8x32xf32, #tpu.memory_space<vmem>>, vector<1x8x32xf32>
    tpu.vector_store %arg9[%c0_48, %c0_49, %c0_50], %135 {strides = array<i32>} : memref<1x8x32xf32, #tpu.memory_space<vmem>>, vector<1x8x32xf32>,
    return
  }
  func.func @transform_0(%arg0: i32, %arg1: i32) -> (i32, i32, i32) {
    %c0_i32 = arith.constant 0 : i32
    %c0_i32_0 = arith.constant 0 : i32
    %c0_i32_1 = arith.constant 0 : i32
    return %arg0, %c0_i32, %c0_i32_0 : i32, i32, i32
  }
  func.func @transform_1(%arg0: i32, %arg1: i32) -> (i32, i32, i32) {
    %c0_i32 = arith.constant 0 : i32
    %c0_i32_0 = arith.constant 0 : i32
    %c0_i32_1 = arith.constant 0 : i32
    return %arg1, %c0_i32, %c0_i32_0 : i32, i32, i32
  }
  func.func @transform_2(%arg0: i32, %arg1: i32) -> (i32, i32, i32) {
    %c0_i32 = arith.constant 0 : i32
    %c0_i32_0 = arith.constant 0 : i32
    %c0_i32_1 = arith.constant 0 : i32
    return %arg1, %c0_i32, %c0_i32_0 : i32, i32, i32
  }
  func.func @transform_3(%arg0: i32, %arg1: i32) -> (i32, i32, i32) {
    %c0_i32 = arith.constant 0 : i32
    %c0_i32_0 = arith.constant 0 : i32
    %c0_i32_1 = arith.constant 0 : i32
    return %arg1, %c0_i32, %c0_i32_0 : i32, i32, i32
  }
  func.func @transform_4(%arg0: i32, %arg1: i32) -> (i32, i32, i32) {
    %c0_i32 = arith.constant 0 : i32
    %c0_i32_0 = arith.constant 0 : i32
    %c0_i32_1 = arith.constant 0 : i32
    return %arg1, %c0_i32, %c0_i32_0 : i32, i32, i32
  }
  func.func @transform_5(%arg0: i32, %arg1: i32) -> (i32, i32, i32) {
    %c0_i32 = arith.constant 0 : i32
    %c0_i32_0 = arith.constant 0 : i32
    %c0_i32_1 = arith.constant 0 : i32
    return %arg1, %c0_i32, %c0_i32_0 : i32, i32, i32
  }
  func.func @transform_6(%arg0: i32, %arg1: i32) -> (i32, i32, i32) {
    %c0_i32 = arith.constant 0 : i32
    %c0_i32_0 = arith.constant 0 : i32
    %c0_i32_1 = arith.constant 0 : i32
    return %arg1, %c0_i32, %c0_i32_0 : i32, i32, i32
  }
  func.func @transform_7(%arg0: i32, %arg1: i32) -> (i32, i32, i32) {
    %c0_i32 = arith.constant 0 : i32
    %c0_i32_0 = arith.constant 0 : i32
    %c0_i32_1 = arith.constant 0 : i32
    return %arg0, %c0_i32, %c0_i32_0 : i32, i32, i32
  }
  func.func @transform_8(%arg0: i32, %arg1: i32) -> (i32, i32, i32, i32) {
    %c0_i32 = arith.constant 0 : i32
    %c0_i32_0 = arith.constant 0 : i32
    %c0_i32_1 = arith.constant 0 : i32
    return %arg1, %arg0, %c0_i32, %c0_i32_0 : i32, i32, i32, i32
  }
}

</mosaic_0001>

<bundles_post_ra>
// kernel: tpu_custom_call.1
= control target key start
LH: loop header
LB: loop body
LE: loop exit
PB: predicated region body
PF: predicated region fallthrough
CT: control target
= control target key end

     0   :  { %s2730_s0 = inlined_call_operand.vmem [shape: f32[2,8,32], index: 0, kind: input, shape index: {}]   ;;  %s2731_s1 = inlined_call_operand.vmem [shape: bf16[2,32,96], index: 1, kind: input, shape index: {}]   ;;  %s2732_s2 = inlined_call_operand.vmem [shape: bf16[2,32,32], index: 2, kind: input, shape index: {}]   ;;  %s2733_s3 = inlined_call_operand.vmem [shape: bf16[2,32,64], index: 3, kind: input, shape index: {}]   ;;  %s2734_s4 = inlined_call_operand.vmem [shape: bf16[2,64,32], index: 4, kind: input, shape index: {}]   ;;  %s2735_s5 = inlined_call_operand.vmem [shape: f32[2,9,32], index: 5, kind: input, shape index: {}]   ;;  %s2736_s6 = inlined_call_operand.vmem [shape: f32[2,1,64], index: 6, kind: input, shape index: {}]   ;;  %s2737_s7 = inlined_call_operand.hbm [shape: f32[2,8,32], index: 7, kind: output, shape index: {0}]   ;;  %s2738_s8 = inlined_call_operand.hbm [shape: f32[2,2,8,8], index: 8, kind: output, shape index: {1}]  }
   0x1   :  { %2757 = sst [smem:[#allocation23_spill]] %s2730_s0 }
   0x2   :  { %2758 = sst [smem:[#allocation24_spill]] %s2731_s1 }
   0x3   :  { %2759 = sst [smem:[#allocation25_spill]] %s2737_s7 }
   0x4   :  { %14 = vsyncpa [#allocation3], 0 }
   0x5   :  { %16 = vsyncpa [#allocation3 + $0x1], 0 }
   0x6   :  { %17 = vsyncpa [#allocation5], 0 }
   0x7   :  { %19 = vsyncpa [#allocation5 + $0x1], 0  ;;  %s2197_s27 = smov 0   ;;  %s2199_s28 = smov 0  }
   0x8   :  { %s2201_s29 = smov 0   ;;  %s2203_s30 = smov 0  }
   0x9   :  { %s2205_s9 = smov 0   ;;  %s2207_s10 = smov 0  }
   0xa   :  { %s2209_s11 = smov 0   ;;  %s2211_s12 = smov 0  }
   0xb   :  { %s2213_s13 = smov 0   ;;  %s2215_s14 = smov 0  }
   0xc   :  { %s2217_s15 = smov 0  }
   0xd LB: > { %2760 = sst [smem:[#allocation8_spill]] %s2097_s27  ;;  %s1730_s16 = sadd.s32 4294967295, %s2137_s15   ;;  %s2137_s15 = sphi %s2217_s15, %s25_s15   ;;  %s2133_s14 = sphi %s2215_s14, %s2801_s14   ;;  %s2129_s13 = sphi %s2213_s13, %s2800_s13   ;;  %s2125_s12 = sphi %s2211_s12, %s2799_s12   ;;  %s2121_s11 = sphi %s2209_s11, %s2798_s11   ;;  %s2117_s10 = sphi %s2207_s10, %s2797_s10   ;;  %s2113_s9 = sphi %s2205_s9, %s2796_s9   ;;  %s2109_s30 = sphi %s2203_s30, %s2795_s30   ;;  %s2105_s29 = sphi %s2201_s29, %s2794_s29   ;;  %s2101_s28 = sphi %s2199_s28, %s2803_s28   ;;  %s2097_s27 = sphi %s2197_s27, %s2802_s27  }
   0xe   : > { %2761 = sst [smem:[#allocation9_spill]] %s2105_s29  ;;  %s1731_s17 = sadd.s32 4294967294, %s2137_s15  }
   0xf   : > { %2762 = sst [smem:[#allocation10_spill]] %s2109_s30  ;;  %s34_s18 = sadd.s32 1, %s2129_s13 }
  0x10   : > { %2763 = sst [smem:[#allocation11_spill]] %s2113_s9  ;;  %s37_s19 = sadd.s32 1, %s2133_s14 }
  0x11   : > { %2764 = sst [smem:[#allocation12_spill]] %s2117_s10  ;;  %p35_p0 = scmp.ge.s32.totalorder %s34_s18, 2 }
  0x12   : > { %2765 = sst [smem:[#allocation13_spill]] %s2129_s13  ;;  %s226_s20 = sadd.s32 1, %s2117_s10 }
  0x13   : > { %2766 = sst [smem:[#allocation14_spill]] %s2133_s14  ;;  %p236_p1 = scmp.ne.s32.totalorder %s2117_s10, %s2113_s9 }
  0x14   : > { %2767 = sst [smem:[#allocation15_spill]] %s2137_s15  ;;  %p2259_p2 = scmp.eq.s32.totalorder %s1730_s16, 3 }
  0x15   : > { %s2805_s18 = smov (%p35_p0, %s34_s18), 0  ;;  %s2807_s19 = smov (!%p35_p0, %s37_s19), %s2133_s14 }
  0x16   : > { %2769 = sst [smem:[#allocation16_spill]] %s2805_s18  ;;  %p2268_p3 = por %p2259_p2, %p236_p1 }
  0x17   : > { %p242_p4 = scmp.ne.s32.totalorder %s2113_s9, %s2109_s30  ;;  %p39_p5 = scmp.ge.s32.totalorder %s2807_s19, 2 }
  0x18   : > { %s2770_s22 = scalar_select %p2268_p3, 1, 0 }
  0x19   : > { %p2274_p6 = scmp.eq.s32.totalorder %s1731_s17, 3  ;;  %s249_s24 = ssub.s32 %s2129_s13, %s2805_s18 }
  0x1a   : > { %2771 = sst [smem:[#allocation17_spill]] %s2770_s22  ;;  %s254_s25 = sadd.s32 1, %s2105_s29 }
  0x1b   : > { %s2809_s19 = smov (%p39_p5, %s2807_s19), 0  ;;  %p2285_p7 = por %p2274_p6, %p242_p4 }
  0x1c   : > { %2773 = sst [smem:[#allocation18_spill]] %s2809_s19  ;;  %p264_p8 = scmp.ne.s32.totalorder %s2105_s29, %s2101_s28 }
  0x1d   : > { %s2774_s26 = scalar_select %p2285_p7, 1, 0 }
  0x1e   : > { %s223_s16 = ssub.s32 %s2133_s14, %s2809_s19  ;;  %p270_p9 = scmp.ne.s32.totalorder %s2101_s28, %s2097_s27 }
  0x1f   : > { %2775 = sst [smem:[#allocation19_spill]] %s2774_s26  ;;  %p224_p10 = scmp.eq.s32.totalorder %s223_s16, 0 }
  0x20   : > { %s251_s17 = sor.u32 %s249_s24, %s223_s16  ;;  %p2297_p12 = por %p264_p8, %p2259_p2 }
  0x21   : > { %p252_p11 = scmp.eq.s32.totalorder %s251_s17, 0  ;;  %p2309_p13 = por %p270_p9, %p2274_p6 }
  0x22   : > { %s2302_s18 = scalar_select %p224_p10, %s2117_s10, %s226_s20  }
  0x23   : > { %s2305_s13 = scalar_select %p252_p11, %s2105_s29, %s254_s25  }
  0x24   : > { %2777 = sst [smem:[#allocation20_spill]] %s2302_s18  ;;  %p1734_p0 = scmp.ge.s32.totalorder %s2137_s15, 1 }
  0x25   : > { %2778 = sst [smem:[#allocation21_spill]] %s2305_s13  ;;  %p342_p1 = scmp.lt.s32.totalorder %s2137_s15, 5 }
  0x26   : > { %s2779_s7 = scalar_select %p2309_p13, 1, 0 }
  0x27   : > { %p343_p4 = pnand %p1734_p0, %p342_p1 }
  0x28   : > { %2780 = sst [smem:[#allocation22_spill]] %s2779_s7  ;;  %s2746_s20 = sand.u32 (!%p343_p4), 1, %s2113_s9  }
  0x29   : > { %346 = sbr.rel (%p343_p4) target bundleno = 2146 (0x862), region = 48  ;;  %s2747_s21 = sand.u32 (!%p343_p4), 1, %s2101_s28  }
  0x2a   : > { %s1735_s23 = sshll.u32 (!%p343_p4), %s2746_s20, 3  ;;  %s2321_s24 = sshll.u32 (!%p343_p4), %s2747_s21, 3 }
  0x2b   : > { %p408_p2 = scmp.lt.s32.totalorder (!%p343_p4), %s2125_s12, 1  ;;  %p412_p5 = scmp.lt.s32.totalorder (!%p343_p4), %s2121_s11, 1 }
  0x2c   : > { %s2781_s0 = sld [smem:[#allocation23_spill]] (!%p343_p4)  ;;  %s407_s15 = scalar_lea.vmem (!%p343_p4), [#allocation4], %s2321_s24 }
  0x2d   : > { %s2782_s1 = sld [smem:[#allocation24_spill]] (!%p343_p4)  ;;  %p1748_p6 = scmp.ne.s32.totalorder (!%p343_p4), %s2121_s11, 0 }
  0x2e   : > { %s409_s25 = scalar_select %p408_p2, %s2125_s12, 1 }
  0x2f   : > { %s2327_s16 = scalar_select %p412_p5, %s2121_s11, 1 }
  0x30   : > { %s1737_s17 = sshll.u32 %s409_s25, 3 }
  0x31   : > { %s1809_s10 = sshll.u32 %s2327_s16, 4  ;;  %s1812_s25 = sshll.u32 %s2327_s16, 5 }
  0x32   : > { %s411_s18 = scalar_lea.vmem %s2781_s0, %s1737_s17  ;;  %s2341_s27 = scalar_lea.vmem %s2732_s2, %s1809_s10 }
  0x33   : > { %s2336_s21 = scalar_lea.vmem %s2782_s1, %s1809_s10  ;;  %s2346_s22 = scalar_lea.vmem %s2733_s3, %s1809_s10 }
  0x34   : > { %s2352_s19 = scalar_lea.vmem %s2734_s4, %s1812_s25  ;;  %s2357_s20 = scalar_lea.vmem %s2735_s5, %s1809_s10 }
  0x35   : > { %s439_s29 = scalar_lea.vmem %s2736_s6, %s2327_s16  ;;  %s2363_s1 = scalar_lea.vmem [#allocation2], %s1735_s23 }
  0x36   : > { %444 = sbr.rel (%p1748_p6) target bundleno = 61 (0x3d), region = 52 }
  0x3b   : > { %v445_v0 = vld [vmem:[%s411_s18] sm:$0xff]  ;;  %vm446_vm0 = vcmask 261120  }
  0x3c   : > { %447 = vst.msk [vmem:[%s2363_s1] sm:$0xff] %vm446_vm0, %v445_v0 }
  0x3d PF: > { %vm452_vm1 = vcmask 261120   ;;  %v2139_v3 = vmov 32.0   ;;  %v1815_v15 = vld [vmem:[%s2336_s21 + $0x8] sm:$0xff]  ;;  %v1814_v16 = vld [vmem:[%s2336_s21] sm:$0xff]  ;;  %s2140_s0 = smov 32   ;;  %s2141_s9 = smov 112  }
  0x3e   : > { %1959 = vrcp.f32 %v2139_v3  ;;  %512 = vmatpush.bf16.msra.mxu0 %v1815_v15  ;;  %v449_v17 = vld [vmem:[%s2357_s20] sm:$0xff]  ;;  %s2142_s10 = smov 120   ;;  %s2143_s18 = smov 104   ;;  %v2146_v50 = vmov 1983009808   ;;  %vm532_vm6 = vcmask 1047556  }
  0x3f   : > { %v642_v18 = vperm.slane %v449_v17, 3  ;;  %v482_v28 = vperm.slane %v449_v17, 0  ;;  %v484_v31 = vperm.slane %v449_v17, 1  ;;  %v519_v39 = vperm.slane %v449_v17, 2  ;;  %s2144_s26 = smov 96   ;;  %s2145_s21 = smov 64  }
  0x40   : > { %v777_v44 = vperm.slane %v449_v17, 4  ;;  %v537_v51 = vunpack.c.l.s4 %v2146_v50  ;;  %v2147_v59 = vmov 1934713408   ;;  %vm920_vm7 = vcmask 64512   ;;  %s2149_s23 = smov 24   ;;  %s2150_s25 = smov 8  }
  0x41   : > { %644 = vrot.lane.b32.xlu1 %v642_v18, %s2140_s0  ;;  %v561_v60 = vunpack.c.l.s4 %v2147_v59  ;;  %vm1124_vm8 = vcmask 1043456   ;;  %s2151_s14 = smov 16   ;;  %s1805_s16 = sshll.u32 %s2121_s11, 1 }
  0x42   : > { %513 = vmatpush.bf16.msra.mxu0 %v1814_v16  ;;  %v2392_v54 = vunpack.c.0.s8 %v537_v51  ;;  %s1553_s0 = sshll.u32 %s407_s15, 4  ;;  %s1554_s0 = int_to_ptr.vmem [resolvable:$true] %s1553_s0 }
  0x43   : > { %v448_v1 = vld [vmem:[%s2363_s1] sm:$0xff] }
  0x44   : > { %v453_v2 = vsel %vm452_vm1, %v448_v1, 0.0  ;;  %v1960_v4 = vpop.eup %1959 }
  0x45   : > { %454 = vadd.xlane.f32.xlu0 %v453_v2  ;;  %v457_v5 = vmul.f32 32.0, %v1960_v4  ;;  %vm461_vm2 = vweird.f32 %v1960_v4 }
  0x47   : > { %v458_v6 = vsub.f32 1.0, %v457_v5 }
  0x49   : > { %v459_v7 = vmul.f32 %v1960_v4, %v458_v6  ;;  %v2403_v6 = vunpack.c.0.s8 %v561_v60 }
  0x4b   : > { %v460_v8 = vadd.f32 %v1960_v4, %v459_v7 }
  0x4d   : > { %v2370_v9 = vsel %vm461_vm2, %v1960_v4, %v460_v8 }
  0xb3   : > { %v645_v35 = vpop.permute.xlu1 %644 }
  0xb8   : > { %v455_v10 = vpop.xlane.xlu0 %454 }
  0xb9   : > { %v463_v11 = vmul.f32 %v2370_v9, %v455_v10 }
  0xbb   : > { %v464_v12 = vsub.f32 %v448_v1, %v463_v11 }
  0xbd   : > { %v465_v13 = vmul.f32 %v464_v12, %v464_v12 }
  0xbf   : > { %v466_v14 = vsel %vm452_vm1, %v465_v13, 0.0 }
  0xc0   : > { %467 = vadd.xlane.f32.xlu0 %v466_v14 }
 0x133   : > { %v468_v19 = vpop.xlane.xlu0 %467 }
 0x134   : > { %v469_v20 = vmul.f32 %v468_v19, %v2370_v9 }
 0x136   : > { %v470_v21 = vadd.f32 1e-05, %v469_v20 }
 0x138   : > { %1961 = vrsqrt.f32 %v470_v21  ;;  %vm477_vm4 = vweird.f32 %v470_v21 }
 0x13e   : > { %v1962_v22 = vpop.eup %1961 }
 0x13f   : > { %v472_v23 = vmul.f32 %v1962_v22, %v470_v21  ;;  %vm478_vm3 = vweird.f32 %v1962_v22 }
 0x140   : > { %vm479_vm5 = vmor %vm477_vm4, %vm478_vm3 }
 0x141   : > { %v473_v24 = vmul.f32 %v1962_v22, %v472_v23 }
 0x143   : > { %v474_v25 = vmul.f32 0.5, %v473_v24 }
 0x145   : > { %v475_v26 = vsub.f32 1.5, %v474_v25 }
 0x147   : > { %v476_v27 = vmul.f32 %v1962_v22, %v475_v26 }
 0x149   : > { %v480_v29 = vsel %vm479_vm5, %v1962_v22, %v476_v27 }
 0x14a   : > { %v481_v30 = vmul.f32 %v480_v29, %v464_v12 }
 0x14c   : > { %v483_v32 = vmul.f32 %v482_v28, %v481_v30 }
 0x14e   : > { %v485_v33 = vadd.f32 %v484_v31, %v483_v32 }
 0x150   : > { %v486_v34 = vpack.c.bf16 %v485_v33, %v485_v33 }
 0x152   : > { %1757 = vmatmul.msk.bf16.vlgmr.msra.gmra.mxu0 %vm452_vm1, %v486_v34 }
 0x1cf   : > { %v2379_v36 = vpop.f32.mrf.mxu0 }
 0x1d0   : > { %v647_v37 = vadd.f32 %v645_v35, %v2379_v36  ;;  %v520_v40 = vadd.f32 %v519_v39, %v2379_v36 }
 0x1d2   : > { %651 = vrot.lane.b32.xlu2 %v647_v37, %s2141_s9  ;;  %649 = vrot.lane.b32.xlu1 %v647_v37, %s2142_s10  ;;  %v534_v56 = vrot.slane %v520_v40, 4 }
 0x1d7   : > { %v517_v38 = vpop.f32.mrf.mxu0 }
 0x1da   : > { %653 = vrot.lane.b32.xlu2 %v647_v37, %s2143_s18 }
 0x1e2   : > { %522 = vrot.lane.b32.xlu2 %v520_v40, %s2142_s10 }
 0x1ea   : > { %528 = vrot.lane.b32.xlu2 %v520_v40, %s2143_s18 }
 0x22c   : > { %v652_v41 = vpop.permute.xlu2 %651 }
 0x234   : > { %v654_v42 = vpop.permute.xlu2 %653 }
 0x235   : > { %v1942_v43 = vpack.i.bf16 %v654_v42, %v652_v41 }
 0x237   : > { %1943 = vrot.lane.b32.xlu1 %v1942_v43, %s2144_s26 }
 0x23c   : > { %v523_v47 = vpop.permute.xlu2 %522 }
 0x23d   : > { %v546_v53 = vrot.slane %v523_v47, 4 }
 0x23f   : > { %525 = vrot.lane.b32.xlu1 %v520_v40, %s2141_s9 }
 0x244   : > { %v650_v45 = vpop.permute.xlu1 %649  ;;  %v529_v48 = vpop.permute.xlu2 %528 }
 0x245   : > { %v1937_v46 = vpack.i.bf16 %v650_v45, %v647_v37  ;;  %v544_v52 = vrot.slane %v529_v48, 4  ;;  %v547_v57 = vsel %vm532_vm6, %v529_v48, %v546_v53 }
 0x246   : > { %v555_v1 = vperm.slane %v547_v57, %v2392_v54 }
 0x247   : > { %1938 = vrot.lane.b32.xlu0 %v1937_v46, %s2144_s26  ;;  %779 = vrot.lane.b32.xlu1 %v777_v44, %s2145_s21  ;;  %v545_v55 = vsel %vm532_vm6, %v544_v52, %v523_v47 }
 0x248   : > { %v551_v63 = vperm.slane %v545_v55, %v2392_v54  ;;  %v568_v11 = vrot.slane %v555_v1, 4 }
 0x24a   : > { %v556_v7 = vrot.slane %v551_v63, 4 }
 0x2a9   : > { %v2390_v49 = vpop.permute.xlu1 %1943 }
 0x2aa   : > { %v1946_v5 = vunpack.i.h.bf16 %v2390_v49  ;;  %v1945_v12 = vunpack.i.l.bf16 %v2390_v49 }
 0x2ac   : > { %v679_v18 = vrot.slane %v1946_v5, 4  ;;  %v667_v25 = vrot.slane %v1945_v12, 4 }
 0x2b1   : > { %v526_v58 = vpop.permute.xlu1 %525 }
 0x2b2   : > { %v531_v61 = vrot.slane %v526_v58, 4  ;;  %v535_v62 = vsel %vm532_vm6, %v526_v58, %v534_v56 }
 0x2b3   : > { %v543_v0 = vperm.slane %v535_v62, %v2392_v54 }
 0x2b4   : > { %v533_v2 = vsel %vm532_vm6, %v531_v61, %v520_v40 }
 0x2b5   : > { %v539_v3 = vperm.slane %v533_v2, %v2392_v54  ;;  %v570_v4 = vrot.slane %v543_v0, 4  ;;  %v569_v20 = vsel %vm532_vm6, %v568_v11, %v543_v0 }
 0x2b6   : > { %v575_v30 = vperm.slane %v569_v20, %v2403_v6 }
 0x2b7   : > { %v558_v8 = vrot.slane %v539_v3, 4  ;;  %v571_v10 = vsel %vm532_vm6, %v555_v1, %v570_v4  ;;  %v557_v14 = vsel %vm532_vm6, %v556_v7, %v539_v3 }
 0x2b8   : > { %v579_v13 = vperm.slane %v571_v10, %v2403_v6  ;;  %v563_v26 = vperm.slane %v557_v14, %v2403_v6  ;;  %v584_v43 = vrot.slane %v575_v30, 4 }
 0x2b9   : > { %v559_v15 = vsel %vm532_vm6, %v551_v63, %v558_v8  ;;  %v1939_v16 = vpop.permute.xlu0 %1938  ;;  %v780_v17 = vpop.permute.xlu1 %779 }
 0x2ba   : > { %v567_v19 = vperm.slane %v559_v15, %v2403_v6  ;;  %v586_v21 = vrot.slane %v579_v13, 4  ;;  %v1941_v22 = vunpack.i.h.bf16 %v1939_v16  ;;  %v1940_v23 = vunpack.i.l.bf16 %v1939_v16 }
 0x2bb   : > { %v2413_v24 = vadd.f32 %v780_v17, %v2379_v36  ;;  %v580_v35 = vrot.slane %v563_v26, 4  ;;  %v585_v59 = vsel %vm532_vm6, 0.0, %v584_v43 }
 0x2bc   : > { %v582_v27 = vrot.slane %v567_v19, 4  ;;  %v680_v28 = vsel %vm532_vm6, %v679_v18, %v1941_v22  ;;  %v681_v29 = vrot.slane %v1941_v22, 4  ;;  %v668_v33 = vsel %vm532_vm6, %v667_v25, %v1940_v23 }
 0x2bd   : > { %788 = vrot.lane.b32.xlu0 %v2413_v24, %s2143_s18  ;;  %784 = vrot.lane.b32.xlu1 %v2413_v24, %s2142_s10  ;;  %v686_v32 = vperm.slane %v680_v28, %v2392_v54  ;;  %v587_v34 = vsel %vm532_vm6, 0.0, %v586_v21  ;;  %v669_v38 = vrot.slane %v1940_v23, 4  ;;  %v599_v40 = vsel %vm532_vm6, %v586_v21, %v575_v30  ;;  %s2783_s10 = sand.u32 1, %s2101_s28  }
 0x2be   : > { %v583_v31 = vsel %vm532_vm6, 0.0, %v582_v27  ;;  %v682_v36 = vsel %vm532_vm6, %v1946_v5, %v681_v29  ;;  %v674_v42 = vperm.slane %v668_v33, %v2392_v54  ;;  %v604_v44 = vrot.slane %v587_v34, 4  ;;  %s1525_s18 = scalar_lea.sflag [#allocation5], %s2783_s10 }
 0x2bf   : > { %v691_v37 = vrot.slane %v686_v32, 4  ;;  %v593_v39 = vrot.slane %v583_v31, 4  ;;  %v690_v41 = vperm.slane %v682_v36, %v2392_v54  ;;  %v670_v45 = vsel %vm532_vm6, %v1945_v12, %v669_v38 }
 0x2c0   : > { %v678_v47 = vperm.slane %v670_v45, %v2392_v54  ;;  %v693_v49 = vrot.slane %v674_v42, 4  ;;  %v581_v50 = vsel %vm532_vm6, 0.0, %v580_v35  ;;  %v588_v51 = vsel %vm532_vm6, %v582_v27, %v563_v26 }
 0x2c1   : > { %v703_v46 = vrot.slane %v690_v41, 4  ;;  %v692_v48 = vsel %vm532_vm6, %v691_v37, %v674_v42  ;;  %v603_v52 = vperm.slane %v599_v40, %v2392_v54  ;;  %v594_v55 = vsel %vm532_vm6, %v593_v39, %v581_v50 }
 0x2c2   : > { %v698_v53 = vperm.slane %v692_v48, %v2403_v6  ;;  %v694_v56 = vsel %vm532_vm6, %v686_v32, %v693_v49  ;;  %v705_v58 = vrot.slane %v678_v47, 4  ;;  %v592_v62 = vperm.slane %v588_v51, %v2392_v54 }
 0x2c3   : > { %v704_v57 = vsel %vm532_vm6, %v703_v46, %v678_v47  ;;  %v702_v60 = vperm.slane %v694_v56, %v2403_v6  ;;  %v605_v63 = vsel %vm532_vm6, %v604_v44, %v585_v59  ;;  %v598_v4 = vperm.slane %v594_v55, %v2392_v54 }
 0x2c4   : > { %v710_v61 = vperm.slane %v704_v57, %v2403_v6  ;;  %v706_v0 = vsel %vm532_vm6, %v690_v41, %v705_v58  ;;  %v715_v2 = vrot.slane %v698_v53, 4  ;;  %v624_v5 = vrot.slane %v603_v52, 4 }
 0x2c5   : > { %786 = vrot.lane.b32.xlu1 %v2413_v24, %s2141_s9  ;;  %v714_v1 = vperm.slane %v706_v0, %v2403_v6  ;;  %v717_v3 = vrot.slane %v702_v60, 4  ;;  %v609_v12 = vperm.slane %v605_v63, %v2392_v54  ;;  %v612_v15 = vrot.slane %v592_v62, 4 }
 0x2c6   : > { %v719_v8 = vrot.slane %v710_v61, 4  ;;  %v716_v16 = vsel %vm532_vm6, 0.0, %v715_v2  ;;  %v610_v19 = vrot.slane %v598_v4, 4 }
 0x2c7   : > { %v718_v7 = vsel %vm532_vm6, 0.0, %v717_v3  ;;  %v721_v10 = vrot.slane %v714_v1, 4  ;;  %v723_v11 = vsel %vm532_vm6, %v717_v3, %v698_v53  ;;  %v613_v29 = vsel %vm532_vm6, %v598_v4, %v612_v15 }
 0x2c8   : > { %v728_v13 = vrot.slane %v718_v7, 4  ;;  %v727_v14 = vperm.slane %v723_v11, %v2392_v54  ;;  %v720_v25 = vsel %vm532_vm6, 0.0, %v719_v8  ;;  %v622_v33 = vrot.slane %v609_v12, 4 }
 0x2c9   : > { %v722_v17 = vsel %vm532_vm6, 0.0, %v721_v10  ;;  %v734_v18 = vsel %vm532_vm6, %v721_v10, %v710_v61  ;;  %v625_v35 = vsel %vm532_vm6, %v609_v12, %v624_v5  ;;  %v611_v36 = vsel %vm532_vm6, %v610_v19, %v592_v62 }
 0x2ca   : > { %v739_v20 = vrot.slane %v722_v17, 4  ;;  %v729_v21 = vsel %vm532_vm6, %v728_v13, %v716_v16  ;;  %v738_v22 = vperm.slane %v734_v18, %v2392_v54  ;;  %v747_v23 = vrot.slane %v727_v14, 4 }
 0x2cb   : > { %v733_v26 = vperm.slane %v729_v21, %v2392_v54  ;;  %v621_v40 = vperm.slane %v613_v29, %v2403_v6  ;;  %v633_v45 = vperm.slane %v625_v35, %v2403_v6  ;;  %v617_v46 = vperm.slane %v611_v36, %v2403_v6 }
 0x2cc   : > { %v740_v27 = vsel %vm532_vm6, %v739_v20, %v720_v25  ;;  %v759_v28 = vrot.slane %v738_v22, 4  ;;  %v623_v47 = vsel %vm532_vm6, %v622_v33, %v603_v52 }
 0x2cd   : > { %v744_v30 = vperm.slane %v740_v27, %v2392_v54  ;;  %v748_v31 = vsel %vm532_vm6, %v733_v26, %v747_v23  ;;  %v745_v32 = vrot.slane %v733_v26, 4  ;;  %v640_v55 = vrot.slane %v621_v40, 4 }
 0x2ce   : > { %v756_v34 = vperm.slane %v748_v31, %v2403_v6  ;;  %v629_v59 = vperm.slane %v623_v47, %v2403_v6  ;;  %v636_v63 = vrot.slane %v617_v46, 4  ;;  %v638_v0 = vrot.slane %v633_v45, 4 }
 0x2cf   : > { %v760_v37 = vsel %vm532_vm6, %v744_v30, %v759_v28  ;;  %v746_v38 = vsel %vm532_vm6, %v745_v32, %v727_v14  ;;  %v757_v39 = vrot.slane %v744_v30, 4  ;;  %v641_v4 = vsel %vm532_vm6, %v633_v45, %v640_v55 }
 0x2d0   : > { %v768_v41 = vperm.slane %v760_v37, %v2403_v6  ;;  %v775_v42 = vrot.slane %v756_v34, 4  ;;  %v752_v43 = vperm.slane %v746_v38, %v2403_v6  ;;  %v634_v5 = vrot.slane %v629_v59, 4 }
 0x2d1   : > { %v758_v44 = vsel %vm532_vm6, %v757_v39, %v738_v22  ;;  %v637_v8 = vsel %vm532_vm6, %v629_v59, %v636_v63  ;;  %v639_v10 = vsel %vm532_vm6, %v638_v0, %v621_v40  ;;  %v915_v11 = vpack.c.bf16 %v641_v4, %v641_v4 }
 0x2d2   : > { %v776_v48 = vsel %vm532_vm6, %v768_v41, %v775_v42  ;;  %v764_v49 = vperm.slane %v758_v44, %v2403_v6  ;;  %v771_v50 = vrot.slane %v752_v43, 4  ;;  %v773_v51 = vrot.slane %v768_v41, 4 }
 0x2d3   : > { %v919_v53 = vpack.c.bf16 %v776_v48, %v776_v48  ;;  %v635_v12 = vsel %vm532_vm6, %v634_v5, %v617_v46  ;;  %v913_v13 = vpack.c.bf16 %v637_v8, %v637_v8  ;;  %v914_v14 = vpack.c.bf16 %v639_v10, %v639_v10 }
 0x2d4   : > { %v772_v56 = vsel %vm532_vm6, %v764_v49, %v771_v50  ;;  %v774_v57 = vsel %vm532_vm6, %v773_v51, %v756_v34  ;;  %v769_v58 = vrot.slane %v764_v49, 4  ;;  %v912_v15 = vpack.c.bf16 %v635_v12, %v635_v12 }
 0x2d5   : > { %v982_v60 = vsel %vm920_vm7, %v919_v53, 0  ;;  %v917_v61 = vpack.c.bf16 %v772_v56, %v772_v56  ;;  %v918_v62 = vpack.c.bf16 %v774_v57, %v774_v57 }
 0x2d6   : > { %991 = vmatpush.bf16.xpose.msrb.mxu0 %v982_v60  ;;  %v770_v52 = vsel %vm532_vm6, %v769_v58, %v752_v43 }
 0x2d7   : > { %v944_v1 = vsel %vm920_vm7, %v917_v61, 0  ;;  %v963_v2 = vsel %vm920_vm7, %v918_v62, 0  ;;  %v916_v3 = vpack.c.bf16 %v770_v52, %v770_v52 }
 0x2d8   : > { %953 = vmatpush.bf16.xpose.msra.mxu2 %v944_v1  ;;  %972 = vmatpush.bf16.xpose.msra.mxu3 %v963_v2 }
 0x2d9   : > { %v925_v7 = vsel %vm920_vm7, %v916_v3, 0 }
 0x2da   : > { %934 = vmatpush.bf16.xpose.msra.mxu1 %v925_v7 }
 0x2dd   : > { %1761 = vmatmul.msk.bf16.vlgmr.msrb.gmra.mxu0 %vm920_vm7, %v915_v11 }
 0x2df   : > { %1759 = vmatmul.msk.bf16.vlgmr.msra.gmra.mxu2 %vm920_vm7, %v913_v13  ;;  %1760 = vmatmul.msk.bf16.vlgmr.msra.gmra.mxu3 %vm920_vm7, %v914_v14 }
 0x2e1   : > { %1758 = vmatmul.msk.bf16.vlgmr.msra.gmra.mxu1 %vm920_vm7, %v912_v15 }
 0x32f   : > { %v785_v27 = vpop.permute.xlu1 %784  ;;  %v789_v31 = vpop.permute.xlu0 %788 }
 0x330   : > { %v1947_v33 = vpack.i.bf16 %v785_v27, %v2413_v24 }
 0x337   : > { %v787_v30 = vpop.permute.xlu1 %786 }
 0x338   : > { %v1952_v32 = vpack.i.bf16 %v789_v31, %v787_v30 }
 0x35a   : > { %v993_v16 = vpop.f32.mrf.mxu0 }
 0x35b   : > { %v1006_v17 = vsel %vm920_vm7, %v993_v16, -inf }
 0x35c   : > { %1007 = vmax.xlane.f32.xlu2 %v1006_v17 }
 0x35e   : > { %v936_v18 = vpop.f32.mrf.mxu1 }
 0x35f   : > { %v997_v19 = vsel %vm920_vm7, %v936_v18, -inf }
 0x360   : > { %998 = vmax.xlane.f32.xlu1 %v997_v19 }
 0x362   : > { %v955_v20 = vpop.f32.mrf.mxu2  ;;  %v974_v21 = vpop.f32.mrf.mxu3 }
 0x363   : > { %v995_v22 = vpop.f32.mrf.mxu0  ;;  %v1000_v23 = vsel %vm920_vm7, %v955_v20, -inf  ;;  %v1003_v25 = vsel %vm920_vm7, %v974_v21, -inf }
 0x364   : > { %1001 = vmax.xlane.f32.xlu0 %v1000_v23  ;;  %1004 = vmax.xlane.f32.xlu2 %v1003_v25 }
 0x366   : > { %v938_v26 = vpop.f32.mrf.mxu1 }
 0x36a   : > { %v957_v28 = vpop.f32.mrf.mxu2  ;;  %v976_v29 = vpop.f32.mrf.mxu3 }
 0x378   : > { %1953 = vrot.lane.b32.xlu0 %v1952_v32, %s2145_s21 }
 0x37c   : > { %1948 = vrot.lane.b32.xlu2 %v1947_v33, %s2145_s21 }
 0x3cf   : > { %v1008_v34 = vpop.xlane.xlu2 %1007 }
 0x3d0   : > { %v1012_v44 = vsub.f32 %v993_v16, %v1008_v34 }
 0x3d2   : > { %v1019_v46 = vmul.f32 1.442695, %v1012_v44 }
 0x3d3   : > { %v999_v35 = vpop.xlane.xlu1 %998 }
 0x3d4   : > { %v1009_v36 = vsub.f32 %v936_v18, %v999_v35 }
 0x3d6   : > { %v1013_v37 = vmul.f32 1.442695, %v1009_v36 }
 0x3d7   : > { %v1002_v38 = vpop.xlane.xlu0 %1001  ;;  %v1005_v39 = vpop.xlane.xlu2 %1004 }
 0x3d8   : > { %1963 = vpow2.f32 %v1013_v37  ;;  %v1010_v40 = vsub.f32 %v955_v20, %v1002_v38  ;;  %v1011_v41 = vsub.f32 %v974_v21, %v1005_v39 }
 0x3da   : > { %v1015_v42 = vmul.f32 1.442695, %v1010_v40  ;;  %v1017_v43 = vmul.f32 1.442695, %v1011_v41 }
 0x3dc   : > { %1965 = vpow2.f32 %v1015_v42 }
 0x3dd   : > { %1967 = vpow2.f32 %v1017_v43 }
 0x3de   : > { %v2502_v45 = vpop.eup %1963  ;;  %1969 = vpow2.f32 %v1019_v46 }
 0x3df   : > { %v1021_v24 = vsel %vm920_vm7, %v2502_v45, 0.0  ;;  %v1949_v50 = vpop.permute.xlu2 %1948 }
 0x3e0   : > { %1022 = vadd.xlane.f32.xlu0 %v1021_v24  ;;  %v1951_v53 = vunpack.i.h.bf16 %v1949_v50  ;;  %v1950_v55 = vunpack.i.l.bf16 %v1949_v50 }
 0x3e2   : > { %v2506_v47 = vpop.eup %1965  ;;  %v816_v58 = vrot.slane %v1951_v53, 4  ;;  %v804_v59 = vrot.slane %v1950_v55, 4 }
 0x3e3   : > { %v2508_v48 = vpop.eup %1967  ;;  %v1024_v49 = vsel %vm920_vm7, %v2506_v47, 0.0 }
 0x3e4   : > { %1025 = vadd.xlane.f32.xlu2 %v1024_v49  ;;  %v1027_v51 = vsel %vm920_vm7, %v2508_v48, 0.0  ;;  %v2514_v56 = vpop.eup %1969 }
 0x3e5   : > { %1028 = vadd.xlane.f32.xlu1 %v1027_v51  ;;  %v1030_v62 = vsel %vm920_vm7, %v2514_v56, 0.0 }
 0x3ea   : > { %v1954_v57 = vpop.permute.xlu0 %1953 }
 0x3eb   : > { %v1956_v60 = vunpack.i.h.bf16 %v1954_v57  ;;  %v1955_v61 = vunpack.i.l.bf16 %v1954_v57 }
 0x3ed   : > { %v814_v52 = vrot.slane %v1956_v60, 4  ;;  %v802_v63 = vrot.slane %v1955_v61, 4  ;;  %v805_v0 = vsel %vm532_vm6, %v1955_v61, %v804_v59  ;;  %v817_v1 = vsel %vm532_vm6, %v1956_v60, %v816_v58  ;;  %1031 = vadd.xlane.f32.xlu1 %v1030_v62 }
 0x3ee   : > { %v813_v2 = vperm.slane %v805_v0, %v2392_v54  ;;  %v825_v3 = vperm.slane %v817_v1, %v2392_v54 }
 0x3ef   : > { %v803_v4 = vsel %vm532_vm6, %v802_v63, %v1950_v55  ;;  %v815_v5 = vsel %vm532_vm6, %v814_v52, %v1951_v53 }
 0x3f0   : > { %v809_v7 = vperm.slane %v803_v4, %v2392_v54  ;;  %v821_v8 = vperm.slane %v815_v5, %v2392_v54  ;;  %v838_v10 = vrot.slane %v825_v3, 4  ;;  %v840_v11 = vrot.slane %v813_v2, 4 }
 0x3f2   : > { %v826_v12 = vrot.slane %v821_v8, 4  ;;  %v828_v13 = vrot.slane %v809_v7, 4  ;;  %v839_v14 = vsel %vm532_vm6, %v838_v10, %v813_v2  ;;  %v841_v15 = vsel %vm532_vm6, %v825_v3, %v840_v11 }
 0x3f3   : > { %v845_v16 = vperm.slane %v839_v14, %v2403_v6  ;;  %v849_v17 = vperm.slane %v841_v15, %v2403_v6 }
 0x3f4   : > { %v827_v18 = vsel %vm532_vm6, %v826_v12, %v809_v7  ;;  %v829_v19 = vsel %vm532_vm6, %v821_v8, %v828_v13  ;;  %v2148_v13 = vmov 4.0  }
 0x3f5   : > { %v833_v20 = vperm.slane %v827_v18, %v2403_v6  ;;  %v837_v21 = vperm.slane %v829_v19, %v2403_v6  ;;  %v854_v22 = vrot.slane %v845_v16, 4  ;;  %v856_v23 = vrot.slane %v849_v17, 4 }
 0x3f7   : > { %v850_v25 = vrot.slane %v833_v20, 4  ;;  %v852_v26 = vrot.slane %v837_v21, 4  ;;  %v857_v27 = vsel %vm532_vm6, 0.0, %v856_v23  ;;  %v869_v28 = vsel %vm532_vm6, %v856_v23, %v845_v16 }
 0x3f8   : > { %v874_v29 = vrot.slane %v857_v27, 4  ;;  %v855_v31 = vsel %vm532_vm6, 0.0, %v854_v22  ;;  %v873_v33 = vperm.slane %v869_v28, %v2392_v54 }
 0x3f9   : > { %v853_v30 = vsel %vm532_vm6, 0.0, %v852_v26  ;;  %v858_v32 = vsel %vm532_vm6, %v852_v26, %v833_v20  ;;  %v851_v37 = vsel %vm532_vm6, 0.0, %v850_v25 }
 0x3fa   : > { %v863_v34 = vrot.slane %v853_v30, 4  ;;  %v862_v35 = vperm.slane %v858_v32, %v2392_v54  ;;  %v875_v36 = vsel %vm532_vm6, %v874_v29, %v855_v31  ;;  %v894_v39 = vrot.slane %v873_v33, 4 }
 0x3fb   : > { %v879_v38 = vperm.slane %v875_v36, %v2392_v54 }
 0x3fc   : > { %v864_v40 = vsel %vm532_vm6, %v863_v34, %v851_v37  ;;  %v882_v41 = vrot.slane %v862_v35, 4 }
 0x3fd   : > { %v868_v42 = vperm.slane %v864_v40, %v2392_v54  ;;  %v895_v43 = vsel %vm532_vm6, %v879_v38, %v894_v39  ;;  %v892_v44 = vrot.slane %v879_v38, 4 }
 0x3fe   : > { %v903_v46 = vperm.slane %v895_v43, %v2403_v6 }
 0x3ff   : > { %v883_v24 = vsel %vm532_vm6, %v868_v42, %v882_v41  ;;  %v880_v49 = vrot.slane %v868_v42, 4  ;;  %v893_v50 = vsel %vm532_vm6, %v892_v44, %v873_v33 }
 0x400   : > { %v891_v51 = vperm.slane %v883_v24, %v2403_v6  ;;  %v908_v53 = vrot.slane %v903_v46, 4  ;;  %v899_v55 = vperm.slane %v893_v50, %v2403_v6 }
 0x401   : > { %v881_v57 = vsel %vm532_vm6, %v880_v49, %v862_v35 }
 0x402   : > { %v909_v58 = vsel %vm532_vm6, %v908_v53, %v891_v51  ;;  %v910_v59 = vrot.slane %v891_v51, 4  ;;  %v887_v60 = vperm.slane %v881_v57, %v2403_v6  ;;  %v904_v61 = vrot.slane %v899_v55, 4 }
 0x403   : > { %v1119_v62 = vpack.c.bf16 %v909_v58, %v909_v58 }
 0x404   : > { %v905_v52 = vsel %vm532_vm6, %v904_v61, %v887_v60  ;;  %v911_v63 = vsel %vm532_vm6, %v903_v46, %v910_v59  ;;  %v906_v0 = vrot.slane %v887_v60, 4 }
 0x405   : > { %v1164_v1 = vsel %vm1124_vm8, %v1119_v62, 0  ;;  %v1117_v2 = vpack.c.bf16 %v905_v52, %v905_v52  ;;  %v1120_v3 = vpack.c.bf16 %v911_v63, %v911_v63 }
 0x406   : > { %1173 = vmatpush.bf16.msrb.mxu3 %v1164_v1  ;;  %v907_v4 = vsel %vm532_vm6, %v899_v55, %v906_v0 }
 0x407   : > { %v1126_v5 = vsel %vm1124_vm8, %v1117_v2, 0  ;;  %v1183_v7 = vsel %vm1124_vm8, %v1120_v3, 0  ;;  %v1118_v8 = vpack.c.bf16 %v907_v4, %v907_v4 }
 0x408   : > { %1135 = vmatpush.bf16.msrb.mxu1 %v1126_v5  ;;  %1192 = vmatpush.bf16.msra.mxu0 %v1183_v7 }
 0x409   : > { %v1145_v10 = vsel %vm1124_vm8, %v1118_v8, 0 }
 0x40a   : > { %1154 = vmatpush.bf16.msrb.mxu2 %v1145_v10 }
 0x453   : > { %v1023_v11 = vpop.xlane.xlu0 %1022 }
 0x454   : > { %1971 = vrcp.f32 %v1023_v11  ;;  %v1042_v19 = vand.u32 2147483647, %v1023_v11  ;;  %v1044_v21 = vand.u32 2147483648, %v1023_v11  ;;  %vm1038_vm10 = vweird.f32 %v1023_v11 }
 0x455   : > { %1973 = vrcp.f32 %v2148_v13 }
 0x456   : > { %vm1043_vm11 = vcmp.eq.f32.partialorder %v1042_v19, 8.507059e+37  ;;  %v1045_v31 = vor.u32 1.1754944e-38, %v1044_v21 }
 0x457   : > { %v1026_v12 = vpop.xlane.xlu2 %1025 }
 0x458   : > { %v1029_v14 = vpop.xlane.xlu1 %1028  ;;  %1975 = vrcp.f32 %v1026_v12  ;;  %v1057_v33 = vand.u32 2147483647, %v1026_v12  ;;  %v1059_v34 = vand.u32 2147483648, %v1026_v12  ;;  %vm1053_vm15 = vweird.f32 %v1026_v12 }
 0x459   : > { %1977 = vrcp.f32 %v1029_v14  ;;  %v1074_v36 = vand.u32 2147483648, %v1029_v14  ;;  %v1072_v39 = vand.u32 2147483647, %v1029_v14  ;;  %vm1068_vm0 = vweird.f32 %v1029_v14 }
 0x45a   : > { %v1972_v15 = vpop.eup %1971  ;;  %v1060_v44 = vor.u32 1.1754944e-38, %v1059_v34  ;;  %vm1058_vm4 = vcmp.eq.f32.partialorder %v1057_v33, 8.507059e+37 }
 0x45b   : > { %v1034_v16 = vmul.f32 %v1972_v15, %v1023_v11  ;;  %v2562_v17 = vpop.eup %1973  ;;  %vm1039_vm9 = vweird.f32 %v1972_v15  ;;  %v1075_v49 = vor.u32 1.1754944e-38, %v1074_v36  ;;  %vm1073_vm5 = vcmp.eq.f32.partialorder %v1072_v39, 8.507059e+37 }
 0x45c   : > { %v1105_v28 = vmul.f32 4.0, %v2562_v17  ;;  %vm1040_vm12 = vmor %vm1038_vm10, %vm1039_vm9 }
 0x45d   : > { %v1035_v18 = vsub.f32 1.0, %v1034_v16 }
 0x45e   : > { %v1976_v20 = vpop.eup %1975  ;;  %v1106_v46 = vsub.f32 1.0, %v1105_v28 }
 0x45f   : > { %v1978_v22 = vpop.eup %1977  ;;  %v1036_v23 = vmul.f32 %v1972_v15, %v1035_v18  ;;  %v1049_v25 = vmul.f32 %v1976_v20, %v1026_v12  ;;  %vm1054_vm13 = vweird.f32 %v1976_v20 }
 0x460   : > { %v1064_v26 = vmul.f32 %v1978_v22, %v1029_v14  ;;  %v1032_v27 = vpop.xlane.xlu1 %1031  ;;  %vm1069_vm14 = vweird.f32 %v1978_v22  ;;  %vm1055_vm2 = vmor %vm1053_vm15, %vm1054_vm13  ;;  %v1107_v63 = vmul.f32 %v2562_v17, %v1106_v46  ;;  %vm1321_vm13 = vcmask 130048  }
 0x461   : > { %v1037_v29 = vadd.f32 %v1972_v15, %v1036_v23  ;;  %v1050_v30 = vsub.f32 1.0, %v1049_v25  ;;  %1979 = vrcp.f32 %v1032_v27  ;;  %vm1070_vm3 = vmor %vm1068_vm0, %vm1069_vm14  ;;  %v1087_v61 = vand.u32 2147483647, %v1032_v27 }
 0x462   : > { %v1065_v32 = vsub.f32 1.0, %v1064_v26  ;;  %v1089_v62 = vand.u32 2147483648, %v1032_v27  ;;  %vm1083_vm9 = vweird.f32 %v1032_v27  ;;  %v1108_v7 = vadd.f32 %v2562_v17, %v1107_v63 }
 0x463   : > { %v1041_v35 = vsel %vm1040_vm12, %v1972_v15, %v1037_v29  ;;  %v1051_v37 = vmul.f32 %v1976_v20, %v1050_v30  ;;  %vm1109_vm12 = vweird.f32 %v2562_v17  ;;  %vm1323_vm14 = vcmask 195584  }
 0x464   : > { %v1066_v38 = vmul.f32 %v1978_v22, %v1065_v32  ;;  %v1046_v40 = vsel %vm1043_vm11, %v1045_v31, %v1041_v35  ;;  %vm1088_vm11 = vcmp.eq.f32.partialorder %v1087_v61, 8.507059e+37  ;;  %v1110_v15 = vsel %vm1109_vm12, %v2562_v17, %v1108_v7 }
 0x465   : > { %v1052_v41 = vadd.f32 %v1976_v20, %v1051_v37  ;;  %v1093_v42 = vmul.f32 %v2502_v45, %v1046_v40 }
 0x466   : > { %v1067_v43 = vadd.f32 %v1978_v22, %v1066_v38 }
 0x467   : > { %v1980_v24 = vpop.eup %1979  ;;  %v1056_v50 = vsel %vm1055_vm2, %v1976_v20, %v1052_v41  ;;  %v1113_v51 = vpack.c.bf16 %v1093_v42, %v1093_v42 }
 0x468   : > { %v1071_v53 = vsel %vm1070_vm3, %v1978_v22, %v1067_v43  ;;  %v1079_v55 = vmul.f32 %v1980_v24, %v1032_v27  ;;  %v1061_v57 = vsel %vm1058_vm4, %v1060_v44, %v1056_v50  ;;  %vm1084_vm8 = vweird.f32 %v1980_v24 }
 0x469   : > { %1762 = vmatmul.msk.bf16.vlgmr.msrb.gmra.mxu1 %vm920_vm7, %v1113_v51  ;;  %v1094_v58 = vmul.f32 %v2506_v47, %v1061_v57  ;;  %v1076_v45 = vsel %vm1073_vm5, %v1075_v49, %v1071_v53  ;;  %v1097_v47 = vsel %vm920_vm7, %v1093_v42, 0.0  ;;  %vm1085_vm10 = vmor %vm1083_vm9, %vm1084_vm8  ;;  %vm1500_vm5 = vcmask 523264  }
 0x46a   : > { %v1080_v59 = vsub.f32 1.0, %v1079_v55  ;;  %v1095_v60 = vmul.f32 %v2508_v48, %v1076_v45  ;;  %v1090_v48 = vor.u32 1.1754944e-38, %v1089_v62 }
 0x46b   : > { %v1114_v52 = vpack.c.bf16 %v1094_v58, %v1094_v58  ;;  %v1098_v1 = vsel %vm920_vm7, %v1094_v58, 0.0 }
 0x46c   : > { %v1081_v0 = vmul.f32 %v1980_v24, %v1080_v59  ;;  %v1115_v2 = vpack.c.bf16 %v1095_v60, %v1095_v60  ;;  %v1099_v4 = vadd.f32 %v1098_v1, %v1097_v47  ;;  %v1100_v11 = vsel %vm920_vm7, %v1095_v60, 0.0 }
 0x46d   : > { %1763 = vmatmul.msk.bf16.vlgmr.msrb.gmra.mxu2 %vm920_vm7, %v1114_v52 }
 0x46e   : > { %v1082_v3 = vadd.f32 %v1980_v24, %v1081_v0  ;;  %1764 = vmatmul.msk.bf16.vlgmr.msrb.gmra.mxu3 %vm920_vm7, %v1115_v2  ;;  %v1101_v12 = vadd.f32 %v1100_v11, %v1099_v4 }
 0x470   : > { %v1086_v5 = vsel %vm1085_vm10, %v1980_v24, %v1082_v3 }
 0x471   : > { %v1091_v8 = vsel %vm1088_vm11, %v1090_v48, %v1086_v5 }
 0x472   : > { %v1096_v10 = vmul.f32 %v2514_v56, %v1091_v8 }
 0x474   : > { %v1116_v13 = vpack.c.bf16 %v1096_v10, %v1096_v10  ;;  %v1102_v14 = vsel %vm920_vm7, %v1096_v10, 0.0 }
 0x475   : > { %v1103_v16 = vadd.f32 %v1102_v14, %v1101_v12 }
 0x476   : > { %1765 = vmatmul.msk.bf16.vlgmr.msra.gmra.mxu0 %vm920_vm7, %v1116_v13 }
 0x477   : > { %v1111_v18 = vmul.f32 %v1110_v15, %v1103_v16 }
 0x479   : > { %1112 = vst.msk [vmem:[%s407_s15] sm:$0xff] %vm920_vm7, %v1111_v18 }
 0x4e6   : > { %v1137_v19 = vpop.f32.mrf.mxu1 }
 0x4e7   : > { %v1200_v21 = vrot.slane %v1137_v19, 4 }
 0x4ee   : > { %v1139_v20 = vpop.f32.mrf.mxu1 }
 0x4f0   : > { %v1156_v22 = vpop.f32.mrf.mxu2 }
 0x4f1   : > { %v1212_v56 = vrot.slane %v1156_v22, 4  ;;  %v1175_v23 = vpop.f32.mrf.mxu3 }
 0x4f2   : > { %v1198_v25 = vrot.slane %v1175_v23, 4  ;;  %v1201_v26 = vsel %vm532_vm6, %v1175_v23, %v1200_v21 }
 0x4f3   : > { %v1209_v27 = vperm.slane %v1201_v26, %v2392_v54  ;;  %v1194_v28 = vpop.f32.mrf.mxu0 }
 0x4f4   : > { %v1199_v17 = vsel %vm532_vm6, %v1198_v25, %v1137_v19  ;;  %v1210_v29 = vrot.slane %v1194_v28, 4  ;;  %v1213_v30 = vsel %vm532_vm6, %v1194_v28, %v1212_v56 }
 0x4f5   : > { %v1205_v31 = vperm.slane %v1199_v17, %v2392_v54  ;;  %v1236_v32 = vrot.slane %v1209_v27, 4  ;;  %v1221_v33 = vperm.slane %v1213_v30, %v2392_v54 }
 0x4f6   : > { %v1211_v34 = vsel %vm532_vm6, %v1210_v29, %v1156_v22 }
 0x4f7   : > { %v1224_v35 = vrot.slane %v1205_v31, 4  ;;  %v1217_v36 = vperm.slane %v1211_v34, %v2392_v54  ;;  %v1234_v37 = vrot.slane %v1221_v33, 4  ;;  %v1237_v38 = vsel %vm532_vm6, %v1221_v33, %v1236_v32  ;;  %v1985_v34 = vld [vmem:[%s2357_s20] sm:$0xff] }
 0x4f8   : > { %v1245_v39 = vperm.slane %v1237_v38, %v2403_v6  ;;  %v1158_v40 = vpop.f32.mrf.mxu2  ;;  %v1986_v38 = vld [vmem:[%s2363_s1] sm:$0xff] }
 0x4f9   : > { %v1222_v41 = vrot.slane %v1217_v36, 4  ;;  %v1225_v42 = vsel %vm532_vm6, %v1217_v36, %v1224_v35  ;;  %v1235_v43 = vsel %vm532_vm6, %v1234_v37, %v1209_v27  ;;  %v1177_v44 = vpop.f32.mrf.mxu3  ;;  %v1816_v27 = vld [vmem:[%s2341_s27] sm:$0xff]  ;;  %v1330_v35 = vperm.slane %v1985_v34, 5 }
 0x4fa   : > { %v1233_v46 = vperm.slane %v1225_v42, %v2403_v6  ;;  %v1241_v24 = vperm.slane %v1235_v43, %v2403_v6  ;;  %v1252_v49 = vrot.slane %v1245_v39, 4 }
 0x4fb   : > { %v1223_v50 = vsel %vm532_vm6, %v1222_v41, %v1205_v31  ;;  %v1196_v51 = vpop.f32.mrf.mxu0 }
 0x4fc   : > { %v1229_v53 = vperm.slane %v1223_v50, %v2403_v6  ;;  %v1248_v55 = vrot.slane %v1233_v46, 4  ;;  %v1250_v57 = vrot.slane %v1241_v24, 4  ;;  %v1253_v58 = vsel %vm532_vm6, 0.0, %v1252_v49  ;;  %v1818_v50 = vld [vmem:[%s2346_s22] sm:$0xff] }
 0x4fd   : > { %v1265_v45 = vsel %vm532_vm6, %v1252_v49, %v1241_v24  ;;  %v1270_v59 = vrot.slane %v1253_v58, 4  ;;  %v1819_v49 = vld [vmem:[%s2346_s22 + $0x8] sm:$0xff] }
 0x4fe   : > { %v1246_v60 = vrot.slane %v1229_v53, 4  ;;  %v1249_v61 = vsel %vm532_vm6, 0.0, %v1248_v55  ;;  %v1251_v62 = vsel %vm532_vm6, 0.0, %v1250_v57  ;;  %v1254_v52 = vsel %vm532_vm6, %v1248_v55, %v1229_v53  ;;  %1415 = vmatpush.bf16.msra.mxu2 %v1819_v49 }
 0x4ff   : > { %v1259_v63 = vrot.slane %v1249_v61, 4  ;;  %v1258_v0 = vperm.slane %v1254_v52, %v2392_v54  ;;  %v1269_v1 = vperm.slane %v1265_v45, %v2392_v54  ;;  %v1271_v2 = vsel %vm532_vm6, %v1270_v59, %v1251_v62 }
 0x500   : > { %v1247_v3 = vsel %vm532_vm6, 0.0, %v1246_v60  ;;  %v1275_v47 = vperm.slane %v1271_v2, %v2392_v54  ;;  %v1382_v62 = vperm.slane %v1985_v34, 6 }
 0x501   : > { %v1260_v48 = vsel %vm532_vm6, %v1259_v63, %v1247_v3  ;;  %v1278_v4 = vrot.slane %v1258_v0, 4  ;;  %v1290_v5 = vrot.slane %v1269_v1, 4  ;;  %v1957_v3 = vld [vmem:[%s439_s29] ss:$0 sm:$0xff] }
 0x502   : > { %v1264_v7 = vperm.slane %v1260_v48, %v2392_v54  ;;  %v1288_v8 = vrot.slane %v1275_v47, 4  ;;  %1416 = vmatpush.bf16.msra.mxu2 %v1818_v50 }
 0x503   : > { %v1291_v11 = vsel %vm532_vm6, %v1275_v47, %v1290_v5 }
 0x504   : > { %v1279_v10 = vsel %vm532_vm6, %v1264_v7, %v1278_v4  ;;  %v1276_v12 = vrot.slane %v1264_v7, 4  ;;  %v1289_v13 = vsel %vm532_vm6, %v1288_v8, %v1269_v1  ;;  %v1299_v18 = vperm.slane %v1291_v11, %v2403_v6 }
 0x505   : > { %v1287_v14 = vperm.slane %v1279_v10, %v2403_v6  ;;  %v1295_v15 = vperm.slane %v1289_v13, %v2403_v6 }
 0x506   : > { %v1277_v16 = vsel %vm532_vm6, %v1276_v12, %v1258_v0  ;;  %v1304_v25 = vrot.slane %v1299_v18, 4  ;;  %v1384_v0 = vperm.slane %v1985_v34, 7  ;;  %v1823_v12 = vld [vmem:[%s2352_s19 + $0x18] sm:$0xff] }
 0x507   : > { %v1306_v19 = vrot.slane %v1287_v14, 4  ;;  %v1283_v54 = vperm.slane %v1277_v16, %v2403_v6  ;;  %v1300_v20 = vrot.slane %v1295_v15, 4  ;;  %v1817_v6 = vld [vmem:[%s2341_s27 + $0x8] sm:$0xff]  ;;  %1508 = vmatpush.bf16.msra.mxu3 %v1823_v12 }
 0x508   : > { %v1305_v26 = vsel %vm532_vm6, %v1304_v25, %v1287_v14  ;;  %1352 = vmatpush.bf16.msra.mxu1 %v1817_v6  ;;  %v1820_v25 = vld [vmem:[%s2352_s19] sm:$0xff] }
 0x509   : > { %v1307_v21 = vsel %vm532_vm6, %v1299_v18, %v1306_v19  ;;  %v1302_v22 = vrot.slane %v1283_v54, 4  ;;  %v1301_v56 = vsel %vm532_vm6, %v1300_v20, %v1283_v54  ;;  %v1822_v18 = vld [vmem:[%s2352_s19 + $0x10] sm:$0xff] }
 0x50a   : > { %1317 = vrot.lane.b32.xlu2 %v1307_v21, %s2149_s23  ;;  %v1821_v21 = vld [vmem:[%s2352_s19 + $0x8] sm:$0xff]  ;;  %s1549_s19 = sadd.s32 %s2125_s12, %s1805_s16 }
 0x50b   : > { %v1303_v23 = vsel %vm532_vm6, %v1295_v15, %v1302_v22  ;;  %1509 = vmatpush.bf16.msra.mxu3 %v1822_v18  ;;  %s1806_s17 = sshll.u32 %s1549_s19, 3 }
 0x50c   : > { %1309 = vrot.lane.b32.xlu1 %v1303_v23, %s2150_s25  ;;  %1353 = vmatpush.bf16.msra.mxu1 %v1816_v27  ;;  %s1551_s29 = scalar_lea.hbm %s2738_s8, %s1806_s17  ;;  %s2007_s25 = scalar_lea.hbm %s2738_s8, 32 }
 0x50d   : > { %s1555_s9 = sshll.u32 %s1551_s29, 4  ;;  %s1556_s9 = int_to_ptr.hbm [resolvable:$true] %s1555_s9 }
 0x50e   : > { %s2001_s26 = sshra.s32 %s1556_s9, 4  ;;  %s2002_s26 = int_to_ptr.hbm [resolvable:$true] %s2001_s26 }
 0x50f   : > { %1510 = vmatpush.bf16.msra.mxu3 %v1821_v21  ;;  %s2003_s21 = scalar_lea.hbm %s2002_s26, 8  ;;  %p2008_p11 = scmp.lt.s32.totalorder %s2002_s26, %s2738_s8 }
 0x510   : > { %p2004_p8 = scmp.ne.s32.totalorder %s2002_s26, %s2003_s21  ;;  %p2009_p0 = scmp.lt.s32.totalorder %s2007_s25, %s2003_s21 }
 0x512   : > { %p2005_p9 = pnand %p2004_p8, %p2297_p12  ;;  %p2010_p1 = por %p2009_p0, %p2008_p11 }
 0x513   : > { %1511 = vmatpush.bf16.msra.mxu3 %v1820_v25 }
 0x514   : > { %1313 = vrot.lane.b32.xlu1 %v1305_v26, %s2151_s14  ;;  %p2006_p10 = pneg %p2005_p9 }
 0x516   : > { %p2011_p4 = pnand %p2010_p1, %p2006_p10 }
 0x564   : > { %v1318_v30 = vpop.permute.xlu2 %1317 }
 0x57e   : > { %v1310_v28 = vpop.permute.xlu1 %1309 }
 0x57f   : > { %v1320_v17 = vsel %vm920_vm7, %v1301_v56, %v1310_v28 }
 0x586   : > { %v1314_v29 = vpop.permute.xlu1 %1313 }
 0x587   : > { %v1322_v31 = vsel %vm1321_vm13, %v1320_v17, %v1314_v29 }
 0x588   : > { %v1324_v32 = vsel %vm1323_vm14, %v1322_v31, %v1318_v30 }
 0x589   : > { %v1325_v33 = vpack.c.bf16 %v1324_v32, %v1324_v32 }
 0x58b   : > { %1774 = vmatmul.msk.bf16.vlgmr.msra.gmra.mxu1 %vm452_vm1, %v1325_v33 }
 0x608   : > { %v1355_v36 = vpop.f32.mrf.mxu1 }
 0x609   : > { %v1356_v37 = vadd.f32 %v1355_v36, %v1330_v35 }
 0x60b   : > { %v2630_v39 = vadd.f32 %v1986_v38, %v1356_v37 }
 0x60d   : > { %v1360_v40 = vsel %vm452_vm1, %v2630_v39, 0.0 }
 0x60e   : > { %1361 = vadd.xlane.f32.xlu1 %v1360_v40 }
 0x610   : > { %v1357_v41 = vpop.f32.mrf.mxu1 }
 0x681   : > { %v1362_v42 = vpop.xlane.xlu1 %1361 }
 0x682   : > { %v1363_v43 = vmul.f32 %v1362_v42, %v2370_v9 }
 0x684   : > { %v1364_v44 = vsub.f32 %v2630_v39, %v1363_v43 }
 0x686   : > { %v1365_v46 = vmul.f32 %v1364_v44, %v1364_v44 }
 0x688   : > { %v1366_v24 = vsel %vm452_vm1, %v1365_v46, 0.0 }
 0x689   : > { %1367 = vadd.xlane.f32.xlu0 %v1366_v24 }
 0x6fc   : > { %v1368_v51 = vpop.xlane.xlu0 %1367 }
 0x6fd   : > { %v1369_v53 = vmul.f32 %v1368_v51, %v2370_v9 }
 0x6ff   : > { %v1370_v55 = vadd.f32 1e-05, %v1369_v53 }
 0x701   : > { %1981 = vrsqrt.f32 %v1370_v55  ;;  %vm1377_vm7 = vweird.f32 %v1370_v55 }
 0x707   : > { %v1982_v57 = vpop.eup %1981 }
 0x708   : > { %v1372_v58 = vmul.f32 %v1982_v57, %v1370_v55  ;;  %vm1378_vm6 = vweird.f32 %v1982_v57 }
 0x709   : > { %vm1379_vm15 = vmor %vm1377_vm7, %vm1378_vm6 }
 0x70a   : > { %v1373_v45 = vmul.f32 %v1982_v57, %v1372_v58 }
 0x70c   : > { %v1374_v59 = vmul.f32 0.5, %v1373_v45 }
 0x70e   : > { %v1375_v60 = vsub.f32 1.5, %v1374_v59 }
 0x710   : > { %v1376_v61 = vmul.f32 %v1982_v57, %v1375_v60 }
 0x712   : > { %v1380_v52 = vsel %vm1379_vm15, %v1982_v57, %v1376_v61 }
 0x713   : > { %v1381_v63 = vmul.f32 %v1380_v52, %v1364_v44 }
 0x715   : > { %v1383_v1 = vmul.f32 %v1382_v62, %v1381_v63 }
 0x717   : > { %v1385_v2 = vadd.f32 %v1384_v0, %v1383_v1 }
 0x719   : > { %v1386_v9 = vpack.c.bf16 %v1385_v2, %v1385_v2 }
 0x71b   : > { %1783 = vmatmul.msk.bf16.vlgmr.msra.gmra.mxu2 %vm452_vm1, %v1386_v9 }
 0x79e   : > { %v1418_v47 = vpop.f32.mrf.mxu2 }
 0x79f   : > { %v1419_v48 = vadd.f32 %v1957_v3, %v1418_v47 }
 0x7a1   : > { %v1423_v4 = vmul.f32 0.70710677, %v1419_v48  ;;  %v1422_v24 = vmul.f32 0.5, %v1419_v48 }
 0x7a3   : > { %v1424_v5 = vmul.f32 %v1423_v4, %v1423_v4 }
 0x7a5   : > { %v1425_v7 = vmin.f32 %v1424_v5, 16.0 }
 0x7a6   : > { %v1420_v8 = vpop.f32.mrf.mxu2 }
 0x7a7   : > { %v1426_v10 = vmul.f32 2.1237322e-06, %v1425_v7  ;;  %v1437_v11 = vmul.f32 3.8918573e-05, %v1425_v7 }
 0x7a9   : > { %v1427_v13 = vadd.f32 0.00028619796, %v1426_v10  ;;  %v1438_v14 = vadd.f32 0.001143296, %v1437_v11 }
 0x7ab   : > { %v1428_v15 = vmul.f32 %v1427_v13, %v1425_v7  ;;  %v1439_v16 = vmul.f32 %v1438_v14, %v1425_v7 }
 0x7ad   : > { %v1440_v19 = vadd.f32 0.014752088, %v1439_v16  ;;  %v1429_v54 = vadd.f32 0.0036580483, %v1428_v15 }
 0x7af   : > { %v1441_v20 = vmul.f32 %v1440_v19, %v1425_v7  ;;  %v1430_v56 = vmul.f32 %v1429_v54, %v1425_v7 }
 0x7b1   : > { %v1442_v22 = vadd.f32 0.112945676, %v1441_v20  ;;  %v1431_v6 = vadd.f32 0.05243302, %v1430_v56 }
 0x7b3   : > { %v1443_v23 = vmul.f32 %v1442_v22, %v1425_v7  ;;  %v1432_v17 = vmul.f32 %v1431_v6, %v1425_v7 }
 0x7b5   : > { %v1444_v26 = vadd.f32 0.4994258, %v1443_v23  ;;  %v1433_v29 = vadd.f32 0.18741608, %v1432_v17 }
 0x7b7   : > { %v1445_v27 = vmul.f32 %v1444_v26, %v1425_v7  ;;  %v1434_v31 = vmul.f32 %v1433_v29, %v1425_v7 }
 0x7b9   : > { %v1446_v28 = vadd.f32 1.0, %v1445_v27  ;;  %v1435_v35 = vadd.f32 1.1283791, %v1434_v31 }
 0x7bb   : > { %1983 = vrcp.f32 %v1446_v28  ;;  %v1458_v34 = vand.u32 2147483648, %v1446_v28  ;;  %v1456_v37 = vand.u32 2147483647, %v1446_v28  ;;  %vm1452_vm2 = vweird.f32 %v1446_v28 }
 0x7bc   : > { %v1436_v41 = vmul.f32 %v1435_v35, %v1423_v4 }
 0x7bd   : > { %v1459_v40 = vor.u32 1.1754944e-38, %v1458_v34  ;;  %vm1457_vm4 = vcmp.eq.f32.partialorder %v1456_v37, 8.507059e+37 }
 0x7c1   : > { %v1984_v30 = vpop.eup %1983 }
 0x7c2   : > { %v1448_v32 = vmul.f32 %v1984_v30, %v1446_v28  ;;  %vm1453_vm0 = vweird.f32 %v1984_v30 }
 0x7c3   : > { %vm1454_vm3 = vmor %vm1452_vm2, %vm1453_vm0 }
 0x7c4   : > { %v1449_v33 = vsub.f32 1.0, %v1448_v32 }
 0x7c6   : > { %v1450_v36 = vmul.f32 %v1984_v30, %v1449_v33 }
 0x7c8   : > { %v1451_v38 = vadd.f32 %v1984_v30, %v1450_v36 }
 0x7ca   : > { %v1455_v42 = vsel %vm1454_vm3, %v1984_v30, %v1451_v38 }
 0x7cb   : > { %v1460_v43 = vsel %vm1457_vm4, %v1459_v40, %v1455_v42 }
 0x7cc   : > { %v1461_v44 = vmul.f32 %v1460_v43, %v1436_v41 }
 0x7ce   : > { %v1784_v46 = vclamps-f32 %v1461_v44, 1.0 }
 0x7d0   : > { %v1464_v49 = vadd.f32 1.0, %v1784_v46 }
 0x7d2   : > { %v1465_v50 = vmul.f32 %v1464_v49, %v1422_v24 }
 0x7d4   : > { %v1466_v51 = vpack.c.bf16 %v1465_v50, %v1465_v50 }
 0x7d6   : > { %1801 = vmatmul.msk.bf16.vlgmr.msra.gmra.mxu3 %vm1500_vm5, %v1466_v51 }
 0x7d7   : > { %2014 = shalt.err (!%p2011_p4)
}
 0x7d8   : > { %s2784_s24 = sld [smem:[#allocation11_spill]]  ;;  %s1804_s15 = sshll.u32 %s2125_s12, 3  ;;  %v1958_v53 = vld [vmem:[%s2357_s20 + $0x8] ss:$0 sm:$0xff] }
 0x7d9   : > { %1825 = dma.vmem_to_hbm [thread:$0]  (%p2297_p12), %s1554_s0, 128, %s1556_s9, %s1525_s18  }
 0x7da   : > { %s2786_s17 = sld [smem:[#allocation25_spill]]  ;;  %s1537_s7 = sshll.u32 %s2363_s1, 4  ;;  %s1538_s7 = int_to_ptr.vmem [resolvable:$true] %s1537_s7 }
 0x7de   : > { %s2787_s30 = sand.u32 1, %s2784_s24  }
 0x7df   : > { %s1520_s10 = scalar_lea.sflag [#allocation3], %s2787_s30 }
 0x7e0   : > { %s1535_s13 = scalar_lea.hbm %s2786_s17, %s1804_s15  ;;  %s2035_s18 = scalar_lea.hbm %s2786_s17, 16 }
 0x7e1   : > { %s1539_s29 = sshll.u32 %s1535_s13, 4  ;;  %s1540_s29 = int_to_ptr.hbm [resolvable:$true] %s1539_s29 }
 0x7e2   : > { %s2029_s0 = sshra.s32 %s1540_s29, 4  ;;  %s2030_s0 = int_to_ptr.hbm [resolvable:$true] %s2029_s0 }
 0x7e3   : > { %s2031_s12 = scalar_lea.hbm %s2030_s0, 8  ;;  %p2036_p6 = scmp.lt.s32.totalorder %s2030_s0, %s2786_s17 }
 0x7e4   : > { %p2032_p12 = scmp.ne.s32.totalorder %s2030_s0, %s2031_s12  ;;  %p2037_p8 = scmp.lt.s32.totalorder %s2035_s18, %s2031_s12 }
 0x7e6   : > { %p2033_p2 = pnand %p2032_p12, %p2268_p3  ;;  %p2038_p9 = por %p2037_p8, %p2036_p6 }
 0x7e8   : > { %p2034_p5 = pneg %p2033_p2 }
 0x7ea   : > { %p2039_p10 = pnand %p2038_p9, %p2034_p5 }
 0x859   : > { %v1513_v55 = vpop.f32.mrf.mxu3 }
 0x85a   : > { %v1514_v57 = vadd.f32 %v1958_v53, %v1513_v55 }
 0x85c   : > { %v1517_v58 = vadd.f32 %v1514_v57, %v2630_v39 }
 0x85e   : > { %1518 = vst.msk [vmem:[%s2363_s1] sm:$0xff] %vm452_vm1, %v1517_v58 }
 0x85f   : > { %2042 = shalt.err (!%p2039_p10)
}
 0x860   : > { %1824 = dma.vmem_to_hbm [thread:$0]  (%p2268_p3), %s1538_s7, 128, %s1540_s29, %s1520_s10  }
 0x861   : > { %v1515_v39 = vpop.f32.mrf.mxu3 }
 0x862 PF: > { %s2788_s1 = sld [smem:[#allocation15_spill]] }
 0x863   : > { %s2789_s11 = sld [smem:[#allocation10_spill]] }
 0x868   : > { %p1835_p11 = scmp.ge.s32.totalorder %s2788_s1, 2 }
 0x869   : > { %s1567_s25 = sand.u32 1, %s2789_s11  }
 0x86a   : > { %p1829_p0 = pnand %p1835_p11, %p2285_p7  ;;  %s1568_s14 = scalar_lea.sflag [#allocation3], %s1567_s25 }
 0x86c   : > { %p1830_p1 = pneg %p1829_p0 }
 0x86e   : > { %2088 = dma.done.wait (%p1830_p1), %s1568_s14, 128  }
 0x86f   : > { %2090 = vsyncadd (%p1830_p1), %s1568_s14, 4294967168  ;;  %s2791_s27 = sld [smem:[#allocation8_spill]]  ;;  %p1832_p4 = pnand %p1835_p11, %p2309_p13 }
 0x871   : > { %p1833_p12 = pneg %p1832_p4 }
 0x875   : > { %s1577_s15 = sand.u32 1, %s2791_s27  }
 0x876   : > { %s1578_s22 = scalar_lea.sflag [#allocation5], %s1577_s15 }
 0x877   : > { %2092 = dma.done.wait (%p1833_p12), %s1578_s22, 128  }
 0x878   : > { %2094 = vsyncadd (%p1833_p12), %s1578_s22, 4294967168  ;;  %s25_s15 = sadd.s32 1, %s2788_s1   ;;  %s2793_s16 = sld [smem:[#allocation9_spill]] }
 0x879   : > { %p22_p3 = scmp.ge.s32.totalorder %s25_s15, 6   ;;  %s2794_s29 = sld [smem:[#allocation21_spill]] }
 0x87a   : > { %s2795_s30 = sld [smem:[#allocation11_spill]]  ;;  %s2802_s27 = smov %s2101_s28 }
 0x87b   : > { %s2796_s9 = sld [smem:[#allocation12_spill]] }
 0x87c   : > { %s2797_s10 = sld [smem:[#allocation20_spill]]  ;;  %24 = sbr.rel (!%p22_p3) target bundleno = 13 (0xd), region = 122 }
 0x87d   : > { %s2798_s11 = sld [smem:[#allocation13_spill]] }
 0x87e   : > { %s2799_s12 = sld [smem:[#allocation14_spill]]  ;;  %s2803_s28 = smov %s2793_s16 }
 0x87f   : > { %s2800_s13 = sld [smem:[#allocation16_spill]] }
 0x880   : > { %s2801_s14 = sld [smem:[#allocation18_spill]] }
 0x881   :  { %1584 = vsyncpa [#allocation3], 1 }
 0x882   :  { %1586 = vsyncpa [#allocation3 + $0x1], 1 }
 0x883   :  { %1587 = vsyncpa [#allocation5], 1 }
 0x884   :  { %1589 = vsyncpa [#allocation5 + $0x1], 1 }

</bundles_post_ra>
